<compile_context>
chip_gen: v6e
topology: v6e:2x2x1
jax: 0.10.0
libtpu: 0.0.40
codegen_flags: <defaults>
</compile_context>

<pallas_src>
import jax
import jax.numpy as jnp
from jax.experimental import pallas as pl
from jax.experimental.pallas import tpu as pltpu


# ----------------------------------------------------------------------------
# Fused Pallas kernel
# ----------------------------------------------------------------------------
def fused_mnist_kernel(xph_ref, w1s_ref, b1r_ref, w2s_ref, b2r_ref,
                       wd1_ref, bd1_ref, wd2_ref, bd2_ref,
                       c1_ref, h_ref, out_ref, a1ph_ref):
    """Single-invocation fused forward pass (all batches at once).

    Inputs (all VMEM resident):
      xph_ref : (4, 8*B, 30*Cin)   padded 28x28 input; plane r holds padded
                                   rows with (row % 4 == r), rows ordered
                                   (row//4 major, batch minor); lanes =
                                   (padded col, in-channel).
      w1s_ref : (3, 30*Cin, 2*16*H) conv1 block-structured weight per tap row.
      b1r_ref : (1, 16*H)           conv1 bias in (padded col, channel) layout.
      w2s_ref : (3, 16*H, 2*16*H)   conv2 block-structured weight.
      b2r_ref : (1, 16*H)           conv2 bias.
      wd1_ref : (7, 16*H, H)        dense_1 weight, rows permuted to kernel layout.
      bd1_ref : (1, H), wd2_ref : (H, O), bd2_ref : (1, O).
    Outputs:
      c1_ref  : (2, 7*B, 16*H)  saved conv-block-1 output; plane pe holds pooled
                                rows of parity pe, rows ordered (q major, b minor).
      h_ref   : (B, H)          saved dense_1 output.
      out_ref : (B, O)          logits.
    Scratch:
      a1ph_ref: (2, 8*B, 16*H)  conv1 output, zero-padded for conv2 and split
                                by padded-row parity; rows (s major, b minor)
                                so conv2 row windows are contiguous slices.
    """
    f32 = jnp.float32
    B = h_ref.shape[0]
    W1B = w1s_ref.shape[2] // 2        # 16 * hidden  (= 128)
    W2B = w2s_ref.shape[2] // 2        # 16 * hidden  (= 128)

    b1row = b1r_ref[...]               # hoisted small loads
    b2row = b2r_ref[...]
    bd1 = bd1_ref[...]
    bd2 = bd2_ref[...]

    # Zero the padded conv1-activation scratch once; pad rows/cols stay zero.
    a1ph_ref[...] = jnp.zeros_like(a1ph_ref)

    # ------------- conv block 1: 3x3 conv + bias + ReLU + 2x2 maxpool --------
    # pe = parity of the pooled output row; each pe group produces pooled rows
    # {pe, pe+2, ..., pe+12} (7 rows) for ALL batches in one matmul per
    # (pool-row-phase py, conv-tap-row dy).
    for pe in range(2):
        branch = []
        for py in range(2):                        # row inside pool window
            acc = None
            for dy in range(3):                    # conv tap row
                m = 2 * pe + py + dy               # padded-input row offset
                lo = (m // 4) * B
                win = xph_ref[m % 4, lo:lo + 7 * B, :]          # (7B, 30*Cin)
                t = jnp.dot(win, w1s_ref[dy, :, :],
                            preferred_element_type=f32)
                acc = t if acc is None else acc + t
            branch.append(acc)                     # (7B, 2*W1B)
        pre = jnp.maximum(branch[0], branch[1])            # pool over rows
        pre = jnp.maximum(pre[:, :W1B], pre[:, W1B:])      # pool over cols
        a1g = jnp.maximum(pre + b1row, 0.0)                # bias + ReLU

        c1_ref[pe, :, :] = a1g                     # 128-lane dense store
        # Scatter pooled rows into the parity-split padded buffer:
        # pooled row p -> padded row p+1.
        if pe == 0:        # p = 0,2,..,12 -> padded rows 1,3,..,13 (parity 1)
            a1ph_ref[1, 0:7 * B, :] = a1g
        else:              # p = 1,3,..,13 -> padded rows 2,4,..,14 (parity 0)
            a1ph_ref[0, B:8 * B, :] = a1g

    # ------------- conv block 2 -----------------------------------------------
    branch2 = []
    for py in range(2):
        acc = None
        for dy in range(3):
            m = py + dy
            lo = (m // 2) * B
            win = a1ph_ref[m % 2, lo:lo + 7 * B, :]            # (7B, W1B)
            t = jnp.dot(win, w2s_ref[dy, :, :], preferred_element_type=f32)
            acc = t if acc is None else acc + t
        branch2.append(acc)                        # (7B, 2*W2B)
    pre2 = jnp.maximum(branch2[0], branch2[1])
    pre2 = jnp.maximum(pre2[:, :W2B], pre2[:, W2B:])
    a2 = jnp.maximum(pre2 + b2row, 0.0)            # (7B, W2B), rows (h, b)

    # ------------- dense_1 (saved) + dense_2, all batches at once -------------
    d1 = None
    for hrow in range(7):
        t = jnp.dot(a2[hrow * B:(hrow + 1) * B, :], wd1_ref[hrow, :, :],
                    preferred_element_type=f32)    # (B, H)
        d1 = t if d1 is None else d1 + t
    d1 = d1 + bd1
    h_ref[...] = d1
    out_ref[...] = jnp.dot(d1, wd2_ref[...], preferred_element_type=f32) + bd2


# ----------------------------------------------------------------------------
# Wrapper: cheap layout / weight restructuring + the single pallas_call
# ----------------------------------------------------------------------------
def _prep_inputs(x_nchw, params):
    B, CIN, H, W = x_nchw.shape
    HID = params["w_conv1"].shape[-1]
    OUT = params["w_dense2"].shape[-1]
    f32 = jnp.float32

    # conv1 input: NHWC, pad spatially, merge (col, cin) on lanes, split rows
    # by (row % 4) and order rows (row//4 major, batch minor) so every conv/pool
    # row window in the kernel is a contiguous static slice covering ALL batches.
    xt = jnp.transpose(x_nchw, (0, 2, 3, 1)).astype(f32)         # (B,28,28,Cin)
    xp = jnp.pad(xt, ((0, 0), (1, 1), (1, 1), (0, 0)))           # (B,30,30,Cin)
    xp = xp.reshape(B, H + 2, (W + 2) * CIN)
    xp = jnp.pad(xp, ((0, 0), (0, 2), (0, 0)))                   # rows 30,31 = 0
    xph = xp.reshape(B, 8, 4, (W + 2) * CIN).transpose(2, 1, 0, 3)
    xph = xph.reshape(4, 8 * B, (W + 2) * CIN)

    # Block-structured conv weights: column index = (pool-col-phase px,
    # padded pooled col, out channel); value = w[dy, dx, cin, cout] placed at
    # the input column it must multiply.  Built with one small einsum each.
    jp = jnp.arange(W + 2)[:, None, None, None]       # padded input col
    px = jnp.arange(2)[None, :, None, None]           # pool col phase
    j2 = jnp.arange(16)[None, None, :, None]          # padded pooled col
    dx = jnp.arange(3)[None, None, None, :]           # conv tap col
    sel1 = ((j2 >= 1) & (j2 <= 14) & (jp == 2 * (j2 - 1) + px + dx)).astype(f32)
    w1s = jnp.einsum("yxco,jpwx->yjcpwo", params["w_conv1"], sel1)
    w1s = w1s.reshape(3, (W + 2) * CIN, 2 * 16 * HID)

    jp2 = jnp.arange(16)[:, None, None, None]
    q2 = jnp.arange(16)[None, None, :, None]
    sel2 = ((q2 < 7) & (jp2 == 2 * q2 + px + dx)).astype(f32)
    w2s = jnp.einsum("yxco,jpqx->yjcpqo", params["w_conv2"], sel2)
    w2s = w2s.reshape(3, 16 * HID, 2 * 16 * HID)

    # Bias rows in the (padded col, channel) lane layout; zero on pad columns
    # so the zero-padding of the activations is preserved through ReLU.
    v1 = ((jnp.arange(16) >= 1) & (jnp.arange(16) <= 14)).astype(f32)
    b1row = (v1[:, None] * params["b_conv1"][None, :]).reshape(1, 16 * HID)
    v2 = (jnp.arange(16) < 7).astype(f32)
    b2row = (v2[:, None] * params["b_conv2"][None, :]).reshape(1, 16 * HID)

    # dense_1 weight rows: torch NCHW flatten order (c, h, w) -> kernel layout
    # (h, (w padded to 16, c)).  Replaces the activation flatten-transpose.
    wd1 = params["w_dense1"].reshape(HID, 7, 7, HID).transpose(1, 2, 0, 3)
    wd1 = jnp.pad(wd1, ((0, 0), (0, 9), (0, 0), (0, 0)))
    wd1r = wd1.reshape(7, 16 * HID, HID)

    bd1row = params["b_dense1"].reshape(1, HID)
    bd2row = params["b_dense2"].reshape(1, OUT)
    return (xph, w1s, b1row, w2s, b2row, wd1r, bd1row,
            params["w_dense2"], bd2row)


def mnist_cnn_forward(x_nchw, params):
    """Full forward pass.  Returns (logits, saved_conv1_output_NCHW, saved_dense1)."""
    B, CIN, H, W = x_nchw.shape
    assert (H, W) == (28, 28), "dense_1 requires 28x28 inputs (7*7 after two pools)"
    HID = params["w_conv1"].shape[-1]
    OUT = params["w_dense2"].shape[-1]

    args = _prep_inputs(x_nchw, params)
    vmem = pl.BlockSpec(memory_space=pltpu.MemorySpace.VMEM)

    c1_raw, h, logits = pl.pallas_call(
        fused_mnist_kernel,
        out_shape=(jax.ShapeDtypeStruct((2, 7 * B, 16 * HID), jnp.float32),
                   jax.ShapeDtypeStruct((B, HID), jnp.float32),
                   jax.ShapeDtypeStruct((B, OUT), jnp.float32)),
        in_specs=[vmem] * 9,
        out_specs=(vmem, vmem, vmem),
        scratch_shapes=[pltpu.VMEM((2, 8 * B, 16 * HID), jnp.float32)],
    )(*args)

    # Unpack the saved conv-block-1 output back to NCHW (matches torch .clone()).
    # c1_raw[pe, q*B + b, j2*HID + co] = conv1_pooled[b, co, 2*q + pe, j2 - 1].
    c1 = c1_raw.reshape(2, 7, B, 16, HID)[:, :, :, 1:15, :]     # drop col pad
    c1 = jnp.transpose(c1, (2, 4, 1, 0, 3)).reshape(B, HID, 14, 14)
    return logits, c1, h


# ----------------------------------------------------------------------------
# Pure-JAX reference for verification
# ----------------------------------------------------------------------------
def ref_forward(x_nchw, params):
    x = jnp.transpose(x_nchw, (0, 2, 3, 1))

    def block(x, w, b):
        y = jax.lax.conv_general_dilated(
            x, w, window_strides=(1, 1), padding="SAME",
            dimension_numbers=("NHWC", "HWIO", "NHWC"))
        y = jnp.maximum(y + b, 0.0)
        return jax.lax.reduce_window(y, -jnp.inf, jax.lax.max,
                                     (1, 2, 2, 1), (1, 2, 2, 1), "VALID")

    c1 = block(x, params["w_conv1"], params["b_conv1"])
    c2 = block(c1, params["w_conv2"], params["b_conv2"])
    B = x.shape[0]
    xf = jnp.transpose(c2, (0, 3, 1, 2)).reshape(B, -1)          # torch Flatten
    h = xf @ params["w_dense1"] + params["b_dense1"]
    o = h @ params["w_dense2"] + params["b_dense2"]
    return o, jnp.transpose(c1, (0, 3, 1, 2)), h


# ----------------------------------------------------------------------------
# Main
# ----------------------------------------------------------------------------
if __name__ == "__main__":
    B, CIN, H, W = 2, 1, 28, 28        # 28x28 required: dense_1 expects HID*7*7
    HIDDEN, OUT = 8, 10

    key = jax.random.PRNGKey(0)
    ks = jax.random.split(key, 8)
    params = {
        "w_conv1": 0.1 * jax.random.normal(ks[0], (3, 3, CIN, HIDDEN), jnp.float32),
        "b_conv1": 0.1 * jax.random.normal(ks[1], (HIDDEN,), jnp.float32),
        "w_conv2": 0.1 * jax.random.normal(ks[2], (3, 3, HIDDEN, HIDDEN), jnp.float32),
        "b_conv2": 0.1 * jax.random.normal(ks[3], (HIDDEN,), jnp.float32),
        "w_dense1": 0.05 * jax.random.normal(ks[4], (HIDDEN * 7 * 7, HIDDEN), jnp.float32),
        "b_dense1": 0.05 * jax.random.normal(ks[5], (HIDDEN,), jnp.float32),
        "w_dense2": 0.05 * jax.random.normal(ks[6], (HIDDEN, OUT), jnp.float32),
        "b_dense2": 0.05 * jax.random.normal(ks[7], (OUT,), jnp.float32),
    }
    x = jax.random.normal(jax.random.PRNGKey(42), (B, CIN, H, W), jnp.float32)

    logits, conv1_out, dense1_out = jax.jit(mnist_cnn_forward)(x, params)
    logits = jax.block_until_ready(logits)

    ref_logits, ref_conv1, ref_dense1 = jax.jit(ref_forward)(x, params)

    assert logits.shape == (B, OUT)
    assert conv1_out.shape == (B, HIDDEN, 14, 14)
    assert dense1_out.shape == (B, HIDDEN)
    assert jnp.allclose(conv1_out, ref_conv1, atol=1e-4, rtol=1e-4), "conv1 mismatch"
    assert jnp.allclose(dense1_out, ref_dense1, atol=1e-4, rtol=1e-4), "dense1 mismatch"
    assert jnp.allclose(logits, ref_logits, atol=1e-4, rtol=1e-4), "logits mismatch"

    print("KERNEL_OK")
</pallas_src>

<mosaic_0001>
module attributes {stable_mosaic.version = 11 : i64} {
  func.func @fused_mnist_kernel(%arg0: memref<4x16x30xf32, #tpu.memory_space<vmem>>, %arg1: memref<3x30x256xf32, #tpu.memory_space<vmem>>, %arg2: memref<1x128xf32, #tpu.memory_space<vmem>>, %arg3: memref<3x128x256xf32, #tpu.memory_space<vmem>>, %arg4: memref<1x128xf32, #tpu.memory_space<vmem>>, %arg5: memref<7x128x8xf32, #tpu.memory_space<vmem>>, %arg6: memref<1x8xf32, #tpu.memory_space<vmem>>, %arg7: memref<8x10xf32, #tpu.memory_space<vmem>>, %arg8: memref<1x10xf32, #tpu.memory_space<vmem>>, %arg9: memref<2x14x128xf32, #tpu.memory_space<vmem>>, %arg10: memref<2x8xf32, #tpu.memory_space<vmem>>, %arg11: memref<2x10xf32, #tpu.memory_space<vmem>>, %arg12: memref<2x16x128xf32, #tpu.memory_space<vmem>>) attributes {dimension_semantics = [], scalar_prefetch = 0 : i64, scratch_operands = 1 : i64, tpu.core_type = #tpu.core_type<tc>} {
    %c0 = arith.constant 0 : index
    %c0_0 = arith.constant 0 : index
    %0 = vector.load %arg2[%c0, %c0_0] : memref<1x128xf32, #tpu.memory_space<vmem>>, vector<1x128xf32>
    %c0_1 = arith.constant 0 : index
    %c0_2 = arith.constant 0 : index
    %1 = vector.load %arg4[%c0_1, %c0_2] : memref<1x128xf32, #tpu.memory_space<vmem>>, vector<1x128xf32>
    %c0_3 = arith.constant 0 : index
    %c0_4 = arith.constant 0 : index
    %2 = vector.load %arg6[%c0_3, %c0_4] : memref<1x8xf32, #tpu.memory_space<vmem>>, vector<1x8xf32>
    %c0_5 = arith.constant 0 : index
    %c0_6 = arith.constant 0 : index
    %3 = vector.load %arg8[%c0_5, %c0_6] : memref<1x10xf32, #tpu.memory_space<vmem>>, vector<1x10xf32>
    %cst = arith.constant 0.000000e+00 : f32
    %4 = vector.broadcast %cst : f32 to vector<2x16x128xf32>
    %c0_7 = arith.constant 0 : index
    %c0_8 = arith.constant 0 : index
    %c0_9 = arith.constant 0 : index
    %5 = vector.load %arg12[%c0_7, %c0_8, %c0_9] : memref<2x16x128xf32, #tpu.memory_space<vmem>>, vector<2x16x128xf32>
    tpu.vector_store %arg12[%c0_7, %c0_8, %c0_9], %4 {strides = array<i32>} : memref<2x16x128xf32, #tpu.memory_space<vmem>>, vector<2x16x128xf32>,
    %c0_10 = arith.constant 0 : index
    %c0_11 = arith.constant 0 : index
    %c0_12 = arith.constant 0 : index
    %6 = vector.load %arg0[%c0_10, %c0_11, %c0_12] : memref<4x16x30xf32, #tpu.memory_space<vmem>>, vector<1x14x30xf32>
    %7 = vector.shape_cast %6 : vector<1x14x30xf32> to vector<14x30xf32>
    %c0_13 = arith.constant 0 : index
    %c0_14 = arith.constant 0 : index
    %c0_15 = arith.constant 0 : index
    %8 = vector.load %arg1[%c0_13, %c0_14, %c0_15] : memref<3x30x256xf32, #tpu.memory_space<vmem>>, vector<1x30x256xf32>
    %9 = vector.shape_cast %8 : vector<1x30x256xf32> to vector<30x256xf32>
    %cst_16 = arith.constant dense<0.000000e+00> : vector<14x256xf32>
    %10 = tpu.matmul %7, %9, %cst_16 {dimension_numbers = #tpu.dot_dimension_numbers<[1], [0], [0], [1], [0, 0, 1, 1], [], []>} : vector<14x30xf32>, vector<30x256xf32>, vector<14x256xf32> -> vector<14x256xf32>
    %c1 = arith.constant 1 : index
    %c0_17 = arith.constant 0 : index
    %c0_18 = arith.constant 0 : index
    %11 = vector.load %arg0[%c1, %c0_17, %c0_18] : memref<4x16x30xf32, #tpu.memory_space<vmem>>, vector<1x14x30xf32>
    %12 = vector.shape_cast %11 : vector<1x14x30xf32> to vector<14x30xf32>
    %c1_19 = arith.constant 1 : index
    %c0_20 = arith.constant 0 : index
    %c0_21 = arith.constant 0 : index
    %13 = vector.load %arg1[%c1_19, %c0_20, %c0_21] : memref<3x30x256xf32, #tpu.memory_space<vmem>>, vector<1x30x256xf32>
    %14 = vector.shape_cast %13 : vector<1x30x256xf32> to vector<30x256xf32>
    %cst_22 = arith.constant dense<0.000000e+00> : vector<14x256xf32>
    %15 = tpu.matmul %12, %14, %cst_22 {dimension_numbers = #tpu.dot_dimension_numbers<[1], [0], [0], [1], [0, 0, 1, 1], [], []>} : vector<14x30xf32>, vector<30x256xf32>, vector<14x256xf32> -> vector<14x256xf32>
    %16 = arith.addf %10, %15 : vector<14x256xf32>
    %c2 = arith.constant 2 : index
    %c0_23 = arith.constant 0 : index
    %c0_24 = arith.constant 0 : index
    %17 = vector.load %arg0[%c2, %c0_23, %c0_24] : memref<4x16x30xf32, #tpu.memory_space<vmem>>, vector<1x14x30xf32>
    %18 = vector.shape_cast %17 : vector<1x14x30xf32> to vector<14x30xf32>
    %c2_25 = arith.constant 2 : index
    %c0_26 = arith.constant 0 : index
    %c0_27 = arith.constant 0 : index
    %19 = vector.load %arg1[%c2_25, %c0_26, %c0_27] : memref<3x30x256xf32, #tpu.memory_space<vmem>>, vector<1x30x256xf32>
    %20 = vector.shape_cast %19 : vector<1x30x256xf32> to vector<30x256xf32>
    %cst_28 = arith.constant dense<0.000000e+00> : vector<14x256xf32>
    %21 = tpu.matmul %18, %20, %cst_28 {dimension_numbers = #tpu.dot_dimension_numbers<[1], [0], [0], [1], [0, 0, 1, 1], [], []>} : vector<14x30xf32>, vector<30x256xf32>, vector<14x256xf32> -> vector<14x256xf32>
    %22 = arith.addf %16, %21 : vector<14x256xf32>
    %c1_29 = arith.constant 1 : index
    %c0_30 = arith.constant 0 : index
    %c0_31 = arith.constant 0 : index
    %23 = vector.load %arg0[%c1_29, %c0_30, %c0_31] : memref<4x16x30xf32, #tpu.memory_space<vmem>>, vector<1x14x30xf32>
    %24 = vector.shape_cast %23 : vector<1x14x30xf32> to vector<14x30xf32>
    %c0_32 = arith.constant 0 : index
    %c0_33 = arith.constant 0 : index
    %c0_34 = arith.constant 0 : index
    %25 = vector.load %arg1[%c0_32, %c0_33, %c0_34] : memref<3x30x256xf32, #tpu.memory_space<vmem>>, vector<1x30x256xf32>
    %26 = vector.shape_cast %25 : vector<1x30x256xf32> to vector<30x256xf32>
    %cst_35 = arith.constant dense<0.000000e+00> : vector<14x256xf32>
    %27 = tpu.matmul %24, %26, %cst_35 {dimension_numbers = #tpu.dot_dimension_numbers<[1], [0], [0], [1], [0, 0, 1, 1], [], []>} : vector<14x30xf32>, vector<30x256xf32>, vector<14x256xf32> -> vector<14x256xf32>
    %c2_36 = arith.constant 2 : index
    %c0_37 = arith.constant 0 : index
    %c0_38 = arith.constant 0 : index
    %28 = vector.load %arg0[%c2_36, %c0_37, %c0_38] : memref<4x16x30xf32, #tpu.memory_space<vmem>>, vector<1x14x30xf32>
    %29 = vector.shape_cast %28 : vector<1x14x30xf32> to vector<14x30xf32>
    %c1_39 = arith.constant 1 : index
    %c0_40 = arith.constant 0 : index
    %c0_41 = arith.constant 0 : index
    %30 = vector.load %arg1[%c1_39, %c0_40, %c0_41] : memref<3x30x256xf32, #tpu.memory_space<vmem>>, vector<1x30x256xf32>
    %31 = vector.shape_cast %30 : vector<1x30x256xf32> to vector<30x256xf32>
    %cst_42 = arith.constant dense<0.000000e+00> : vector<14x256xf32>
    %32 = tpu.matmul %29, %31, %cst_42 {dimension_numbers = #tpu.dot_dimension_numbers<[1], [0], [0], [1], [0, 0, 1, 1], [], []>} : vector<14x30xf32>, vector<30x256xf32>, vector<14x256xf32> -> vector<14x256xf32>
    %33 = arith.addf %27, %32 : vector<14x256xf32>
    %c3 = arith.constant 3 : index
    %c0_43 = arith.constant 0 : index
    %c0_44 = arith.constant 0 : index
    %34 = vector.load %arg0[%c3, %c0_43, %c0_44] : memref<4x16x30xf32, #tpu.memory_space<vmem>>, vector<1x14x30xf32>
    %35 = vector.shape_cast %34 : vector<1x14x30xf32> to vector<14x30xf32>
    %c2_45 = arith.constant 2 : index
    %c0_46 = arith.constant 0 : index
    %c0_47 = arith.constant 0 : index
    %36 = vector.load %arg1[%c2_45, %c0_46, %c0_47] : memref<3x30x256xf32, #tpu.memory_space<vmem>>, vector<1x30x256xf32>
    %37 = vector.shape_cast %36 : vector<1x30x256xf32> to vector<30x256xf32>
    %cst_48 = arith.constant dense<0.000000e+00> : vector<14x256xf32>
    %38 = tpu.matmul %35, %37, %cst_48 {dimension_numbers = #tpu.dot_dimension_numbers<[1], [0], [0], [1], [0, 0, 1, 1], [], []>} : vector<14x30xf32>, vector<30x256xf32>, vector<14x256xf32> -> vector<14x256xf32>
    %39 = arith.addf %33, %38 : vector<14x256xf32>
    %40 = arith.maximumf %22, %39 : vector<14x256xf32>
    %41 = vector.extract_strided_slice %40 {offsets = [0, 0], sizes = [14, 128], strides = [1, 1]} : vector<14x256xf32> to vector<14x128xf32>
    %42 = vector.extract_strided_slice %40 {offsets = [0, 128], sizes = [14, 128], strides = [1, 1]} : vector<14x256xf32> to vector<14x128xf32>
    %43 = arith.maximumf %41, %42 : vector<14x128xf32>
    %44 = vector.broadcast %0 : vector<1x128xf32> to vector<14x128xf32>
    %45 = arith.addf %43, %44 : vector<14x128xf32>
    %cst_49 = arith.constant 0.000000e+00 : f32
    %46 = vector.broadcast %cst_49 : f32 to vector<14x128xf32>
    %47 = arith.maximumf %45, %46 : vector<14x128xf32>
    %c0_50 = arith.constant 0 : index
    %c0_51 = arith.constant 0 : index
    %c0_52 = arith.constant 0 : index
    %48 = vector.load %arg9[%c0_50, %c0_51, %c0_52] : memref<2x14x128xf32, #tpu.memory_space<vmem>>, vector<1x14x128xf32>
    %49 = vector.shape_cast %48 : vector<1x14x128xf32> to vector<14x128xf32>
    %50 = vector.shape_cast %47 : vector<14x128xf32> to vector<1x14x128xf32>
    tpu.vector_store %arg9[%c0_50, %c0_51, %c0_52], %50 {strides = array<i32>} : memref<2x14x128xf32, #tpu.memory_space<vmem>>, vector<1x14x128xf32>,
    %c1_53 = arith.constant 1 : index
    %c0_54 = arith.constant 0 : index
    %c0_55 = arith.constant 0 : index
    %51 = vector.load %arg12[%c1_53, %c0_54, %c0_55] : memref<2x16x128xf32, #tpu.memory_space<vmem>>, vector<1x14x128xf32>
    %52 = vector.shape_cast %51 : vector<1x14x128xf32> to vector<14x128xf32>
    %53 = vector.shape_cast %47 : vector<14x128xf32> to vector<1x14x128xf32>
    tpu.vector_store %arg12[%c1_53, %c0_54, %c0_55], %53 {strides = array<i32>} : memref<2x16x128xf32, #tpu.memory_space<vmem>>, vector<1x14x128xf32>,
    %c2_56 = arith.constant 2 : index
    %c0_57 = arith.constant 0 : index
    %c0_58 = arith.constant 0 : index
    %54 = vector.load %arg0[%c2_56, %c0_57, %c0_58] : memref<4x16x30xf32, #tpu.memory_space<vmem>>, vector<1x14x30xf32>
    %55 = vector.shape_cast %54 : vector<1x14x30xf32> to vector<14x30xf32>
    %c0_59 = arith.constant 0 : index
    %c0_60 = arith.constant 0 : index
    %c0_61 = arith.constant 0 : index
    %56 = vector.load %arg1[%c0_59, %c0_60, %c0_61] : memref<3x30x256xf32, #tpu.memory_space<vmem>>, vector<1x30x256xf32>
    %57 = vector.shape_cast %56 : vector<1x30x256xf32> to vector<30x256xf32>
    %cst_62 = arith.constant dense<0.000000e+00> : vector<14x256xf32>
    %58 = tpu.matmul %55, %57, %cst_62 {dimension_numbers = #tpu.dot_dimension_numbers<[1], [0], [0], [1], [0, 0, 1, 1], [], []>} : vector<14x30xf32>, vector<30x256xf32>, vector<14x256xf32> -> vector<14x256xf32>
    %c3_63 = arith.constant 3 : index
    %c0_64 = arith.constant 0 : index
    %c0_65 = arith.constant 0 : index
    %59 = vector.load %arg0[%c3_63, %c0_64, %c0_65] : memref<4x16x30xf32, #tpu.memory_space<vmem>>, vector<1x14x30xf32>
    %60 = vector.shape_cast %59 : vector<1x14x30xf32> to vector<14x30xf32>
    %c1_66 = arith.constant 1 : index
    %c0_67 = arith.constant 0 : index
    %c0_68 = arith.constant 0 : index
    %61 = vector.load %arg1[%c1_66, %c0_67, %c0_68] : memref<3x30x256xf32, #tpu.memory_space<vmem>>, vector<1x30x256xf32>
    %62 = vector.shape_cast %61 : vector<1x30x256xf32> to vector<30x256xf32>
    %cst_69 = arith.constant dense<0.000000e+00> : vector<14x256xf32>
    %63 = tpu.matmul %60, %62, %cst_69 {dimension_numbers = #tpu.dot_dimension_numbers<[1], [0], [0], [1], [0, 0, 1, 1], [], []>} : vector<14x30xf32>, vector<30x256xf32>, vector<14x256xf32> -> vector<14x256xf32>
    %64 = arith.addf %58, %63 : vector<14x256xf32>
    %c0_70 = arith.constant 0 : index
    %c2_71 = arith.constant 2 : index
    %c0_72 = arith.constant 0 : index
    %65 = vector.load %arg0[%c0_70, %c2_71, %c0_72] : memref<4x16x30xf32, #tpu.memory_space<vmem>>, vector<1x14x30xf32>
    %66 = vector.shape_cast %65 : vector<1x14x30xf32> to vector<14x30xf32>
    %c2_73 = arith.constant 2 : index
    %c0_74 = arith.constant 0 : index
    %c0_75 = arith.constant 0 : index
    %67 = vector.load %arg1[%c2_73, %c0_74, %c0_75] : memref<3x30x256xf32, #tpu.memory_space<vmem>>, vector<1x30x256xf32>
    %68 = vector.shape_cast %67 : vector<1x30x256xf32> to vector<30x256xf32>
    %cst_76 = arith.constant dense<0.000000e+00> : vector<14x256xf32>
    %69 = tpu.matmul %66, %68, %cst_76 {dimension_numbers = #tpu.dot_dimension_numbers<[1], [0], [0], [1], [0, 0, 1, 1], [], []>} : vector<14x30xf32>, vector<30x256xf32>, vector<14x256xf32> -> vector<14x256xf32>
    %70 = arith.addf %64, %69 : vector<14x256xf32>
    %c3_77 = arith.constant 3 : index
    %c0_78 = arith.constant 0 : index
    %c0_79 = arith.constant 0 : index
    %71 = vector.load %arg0[%c3_77, %c0_78, %c0_79] : memref<4x16x30xf32, #tpu.memory_space<vmem>>, vector<1x14x30xf32>
    %72 = vector.shape_cast %71 : vector<1x14x30xf32> to vector<14x30xf32>
    %c0_80 = arith.constant 0 : index
    %c0_81 = arith.constant 0 : index
    %c0_82 = arith.constant 0 : index
    %73 = vector.load %arg1[%c0_80, %c0_81, %c0_82] : memref<3x30x256xf32, #tpu.memory_space<vmem>>, vector<1x30x256xf32>
    %74 = vector.shape_cast %73 : vector<1x30x256xf32> to vector<30x256xf32>
    %cst_83 = arith.constant dense<0.000000e+00> : vector<14x256xf32>
    %75 = tpu.matmul %72, %74, %cst_83 {dimension_numbers = #tpu.dot_dimension_numbers<[1], [0], [0], [1], [0, 0, 1, 1], [], []>} : vector<14x30xf32>, vector<30x256xf32>, vector<14x256xf32> -> vector<14x256xf32>
    %c0_84 = arith.constant 0 : index
    %c2_85 = arith.constant 2 : index
    %c0_86 = arith.constant 0 : index
    %76 = vector.load %arg0[%c0_84, %c2_85, %c0_86] : memref<4x16x30xf32, #tpu.memory_space<vmem>>, vector<1x14x30xf32>
    %77 = vector.shape_cast %76 : vector<1x14x30xf32> to vector<14x30xf32>
    %c1_87 = arith.constant 1 : index
    %c0_88 = arith.constant 0 : index
    %c0_89 = arith.constant 0 : index
    %78 = vector.load %arg1[%c1_87, %c0_88, %c0_89] : memref<3x30x256xf32, #tpu.memory_space<vmem>>, vector<1x30x256xf32>
    %79 = vector.shape_cast %78 : vector<1x30x256xf32> to vector<30x256xf32>
    %cst_90 = arith.constant dense<0.000000e+00> : vector<14x256xf32>
    %80 = tpu.matmul %77, %79, %cst_90 {dimension_numbers = #tpu.dot_dimension_numbers<[1], [0], [0], [1], [0, 0, 1, 1], [], []>} : vector<14x30xf32>, vector<30x256xf32>, vector<14x256xf32> -> vector<14x256xf32>
    %81 = arith.addf %75, %80 : vector<14x256xf32>
    %c1_91 = arith.constant 1 : index
    %c2_92 = arith.constant 2 : index
    %c0_93 = arith.constant 0 : index
    %82 = vector.load %arg0[%c1_91, %c2_92, %c0_93] : memref<4x16x30xf32, #tpu.memory_space<vmem>>, vector<1x14x30xf32>
    %83 = vector.shape_cast %82 : vector<1x14x30xf32> to vector<14x30xf32>
    %c2_94 = arith.constant 2 : index
    %c0_95 = arith.constant 0 : index
    %c0_96 = arith.constant 0 : index
    %84 = vector.load %arg1[%c2_94, %c0_95, %c0_96] : memref<3x30x256xf32, #tpu.memory_space<vmem>>, vector<1x30x256xf32>
    %85 = vector.shape_cast %84 : vector<1x30x256xf32> to vector<30x256xf32>
    %cst_97 = arith.constant dense<0.000000e+00> : vector<14x256xf32>
    %86 = tpu.matmul %83, %85, %cst_97 {dimension_numbers = #tpu.dot_dimension_numbers<[1], [0], [0], [1], [0, 0, 1, 1], [], []>} : vector<14x30xf32>, vector<30x256xf32>, vector<14x256xf32> -> vector<14x256xf32>
    %87 = arith.addf %81, %86 : vector<14x256xf32>
    %88 = arith.maximumf %70, %87 : vector<14x256xf32>
    %89 = vector.extract_strided_slice %88 {offsets = [0, 0], sizes = [14, 128], strides = [1, 1]} : vector<14x256xf32> to vector<14x128xf32>
    %90 = vector.extract_strided_slice %88 {offsets = [0, 128], sizes = [14, 128], strides = [1, 1]} : vector<14x256xf32> to vector<14x128xf32>
    %91 = arith.maximumf %89, %90 : vector<14x128xf32>
    %92 = vector.broadcast %0 : vector<1x128xf32> to vector<14x128xf32>
    %93 = arith.addf %91, %92 : vector<14x128xf32>
    %cst_98 = arith.constant 0.000000e+00 : f32
    %94 = vector.broadcast %cst_98 : f32 to vector<14x128xf32>
    %95 = arith.maximumf %93, %94 : vector<14x128xf32>
    %c1_99 = arith.constant 1 : index
    %c0_100 = arith.constant 0 : index
    %c0_101 = arith.constant 0 : index
    %96 = vector.load %arg9[%c1_99, %c0_100, %c0_101] : memref<2x14x128xf32, #tpu.memory_space<vmem>>, vector<1x14x128xf32>
    %97 = vector.shape_cast %96 : vector<1x14x128xf32> to vector<14x128xf32>
    %98 = vector.shape_cast %95 : vector<14x128xf32> to vector<1x14x128xf32>
    tpu.vector_store %arg9[%c1_99, %c0_100, %c0_101], %98 {strides = array<i32>} : memref<2x14x128xf32, #tpu.memory_space<vmem>>, vector<1x14x128xf32>,
    %c0_102 = arith.constant 0 : index
    %c2_103 = arith.constant 2 : index
    %c0_104 = arith.constant 0 : index
    %99 = vector.load %arg12[%c0_102, %c2_103, %c0_104] : memref<2x16x128xf32, #tpu.memory_space<vmem>>, vector<1x14x128xf32>
    %100 = vector.shape_cast %99 : vector<1x14x128xf32> to vector<14x128xf32>
    %101 = vector.shape_cast %95 : vector<14x128xf32> to vector<1x14x128xf32>
    tpu.vector_store %arg12[%c0_102, %c2_103, %c0_104], %101 {strides = array<i32>} : memref<2x16x128xf32, #tpu.memory_space<vmem>>, vector<1x14x128xf32>,
    %c0_105 = arith.constant 0 : index
    %c0_106 = arith.constant 0 : index
    %c0_107 = arith.constant 0 : index
    %102 = vector.load %arg12[%c0_105, %c0_106, %c0_107] : memref<2x16x128xf32, #tpu.memory_space<vmem>>, vector<1x14x128xf32>
    %103 = vector.shape_cast %102 : vector<1x14x128xf32> to vector<14x128xf32>
    %c0_108 = arith.constant 0 : index
    %c0_109 = arith.constant 0 : index
    %c0_110 = arith.constant 0 : index
    %104 = vector.load %arg3[%c0_108, %c0_109, %c0_110] : memref<3x128x256xf32, #tpu.memory_space<vmem>>, vector<1x128x256xf32>
    %105 = vector.shape_cast %104 : vector<1x128x256xf32> to vector<128x256xf32>
    %cst_111 = arith.constant dense<0.000000e+00> : vector<14x256xf32>
    %106 = tpu.matmul %103, %105, %cst_111 {dimension_numbers = #tpu.dot_dimension_numbers<[1], [0], [0], [1], [0, 0, 1, 1], [], []>} : vector<14x128xf32>, vector<128x256xf32>, vector<14x256xf32> -> vector<14x256xf32>
    %c1_112 = arith.constant 1 : index
    %c0_113 = arith.constant 0 : index
    %c0_114 = arith.constant 0 : index
    %107 = vector.load %arg12[%c1_112, %c0_113, %c0_114] : memref<2x16x128xf32, #tpu.memory_space<vmem>>, vector<1x14x128xf32>
    %108 = vector.shape_cast %107 : vector<1x14x128xf32> to vector<14x128xf32>
    %c1_115 = arith.constant 1 : index
    %c0_116 = arith.constant 0 : index
    %c0_117 = arith.constant 0 : index
    %109 = vector.load %arg3[%c1_115, %c0_116, %c0_117] : memref<3x128x256xf32, #tpu.memory_space<vmem>>, vector<1x128x256xf32>
    %110 = vector.shape_cast %109 : vector<1x128x256xf32> to vector<128x256xf32>
    %cst_118 = arith.constant dense<0.000000e+00> : vector<14x256xf32>
    %111 = tpu.matmul %108, %110, %cst_118 {dimension_numbers = #tpu.dot_dimension_numbers<[1], [0], [0], [1], [0, 0, 1, 1], [], []>} : vector<14x128xf32>, vector<128x256xf32>, vector<14x256xf32> -> vector<14x256xf32>
    %112 = arith.addf %106, %111 : vector<14x256xf32>
    %c0_119 = arith.constant 0 : index
    %c2_120 = arith.constant 2 : index
    %c0_121 = arith.constant 0 : index
    %113 = vector.load %arg12[%c0_119, %c2_120, %c0_121] : memref<2x16x128xf32, #tpu.memory_space<vmem>>, vector<1x14x128xf32>
    %114 = vector.shape_cast %113 : vector<1x14x128xf32> to vector<14x128xf32>
    %c2_122 = arith.constant 2 : index
    %c0_123 = arith.constant 0 : index
    %c0_124 = arith.constant 0 : index
    %115 = vector.load %arg3[%c2_122, %c0_123, %c0_124] : memref<3x128x256xf32, #tpu.memory_space<vmem>>, vector<1x128x256xf32>
    %116 = vector.shape_cast %115 : vector<1x128x256xf32> to vector<128x256xf32>
    %cst_125 = arith.constant dense<0.000000e+00> : vector<14x256xf32>
    %117 = tpu.matmul %114, %116, %cst_125 {dimension_numbers = #tpu.dot_dimension_numbers<[1], [0], [0], [1], [0, 0, 1, 1], [], []>} : vector<14x128xf32>, vector<128x256xf32>, vector<14x256xf32> -> vector<14x256xf32>
    %118 = arith.addf %112, %117 : vector<14x256xf32>
    %c1_126 = arith.constant 1 : index
    %c0_127 = arith.constant 0 : index
    %c0_128 = arith.constant 0 : index
    %119 = vector.load %arg12[%c1_126, %c0_127, %c0_128] : memref<2x16x128xf32, #tpu.memory_space<vmem>>, vector<1x14x128xf32>
    %120 = vector.shape_cast %119 : vector<1x14x128xf32> to vector<14x128xf32>
    %c0_129 = arith.constant 0 : index
    %c0_130 = arith.constant 0 : index
    %c0_131 = arith.constant 0 : index
    %121 = vector.load %arg3[%c0_129, %c0_130, %c0_131] : memref<3x128x256xf32, #tpu.memory_space<vmem>>, vector<1x128x256xf32>
    %122 = vector.shape_cast %121 : vector<1x128x256xf32> to vector<128x256xf32>
    %cst_132 = arith.constant dense<0.000000e+00> : vector<14x256xf32>
    %123 = tpu.matmul %120, %122, %cst_132 {dimension_numbers = #tpu.dot_dimension_numbers<[1], [0], [0], [1], [0, 0, 1, 1], [], []>} : vector<14x128xf32>, vector<128x256xf32>, vector<14x256xf32> -> vector<14x256xf32>
    %c0_133 = arith.constant 0 : index
    %c2_134 = arith.constant 2 : index
    %c0_135 = arith.constant 0 : index
    %124 = vector.load %arg12[%c0_133, %c2_134, %c0_135] : memref<2x16x128xf32, #tpu.memory_space<vmem>>, vector<1x14x128xf32>
    %125 = vector.shape_cast %124 : vector<1x14x128xf32> to vector<14x128xf32>
    %c1_136 = arith.constant 1 : index
    %c0_137 = arith.constant 0 : index
    %c0_138 = arith.constant 0 : index
    %126 = vector.load %arg3[%c1_136, %c0_137, %c0_138] : memref<3x128x256xf32, #tpu.memory_space<vmem>>, vector<1x128x256xf32>
    %127 = vector.shape_cast %126 : vector<1x128x256xf32> to vector<128x256xf32>
    %cst_139 = arith.constant dense<0.000000e+00> : vector<14x256xf32>
    %128 = tpu.matmul %125, %127, %cst_139 {dimension_numbers = #tpu.dot_dimension_numbers<[1], [0], [0], [1], [0, 0, 1, 1], [], []>} : vector<14x128xf32>, vector<128x256xf32>, vector<14x256xf32> -> vector<14x256xf32>
    %129 = arith.addf %123, %128 : vector<14x256xf32>
    %c1_140 = arith.constant 1 : index
    %c2_141 = arith.constant 2 : index
    %c0_142 = arith.constant 0 : index
    %130 = vector.load %arg12[%c1_140, %c2_141, %c0_142] : memref<2x16x128xf32, #tpu.memory_space<vmem>>, vector<1x14x128xf32>
    %131 = vector.shape_cast %130 : vector<1x14x128xf32> to vector<14x128xf32>
    %c2_143 = arith.constant 2 : index
    %c0_144 = arith.constant 0 : index
    %c0_145 = arith.constant 0 : index
    %132 = vector.load %arg3[%c2_143, %c0_144, %c0_145] : memref<3x128x256xf32, #tpu.memory_space<vmem>>, vector<1x128x256xf32>
    %133 = vector.shape_cast %132 : vector<1x128x256xf32> to vector<128x256xf32>
    %cst_146 = arith.constant dense<0.000000e+00> : vector<14x256xf32>
    %134 = tpu.matmul %131, %133, %cst_146 {dimension_numbers = #tpu.dot_dimension_numbers<[1], [0], [0], [1], [0, 0, 1, 1], [], []>} : vector<14x128xf32>, vector<128x256xf32>, vector<14x256xf32> -> vector<14x256xf32>
    %135 = arith.addf %129, %134 : vector<14x256xf32>
    %136 = arith.maximumf %118, %135 : vector<14x256xf32>
    %137 = vector.extract_strided_slice %136 {offsets = [0, 0], sizes = [14, 128], strides = [1, 1]} : vector<14x256xf32> to vector<14x128xf32>
    %138 = vector.extract_strided_slice %136 {offsets = [0, 128], sizes = [14, 128], strides = [1, 1]} : vector<14x256xf32> to vector<14x128xf32>
    %139 = arith.maximumf %137, %138 : vector<14x128xf32>
    %140 = vector.broadcast %1 : vector<1x128xf32> to vector<14x128xf32>
    %141 = arith.addf %139, %140 : vector<14x128xf32>
    %cst_147 = arith.constant 0.000000e+00 : f32
    %142 = vector.broadcast %cst_147 : f32 to vector<14x128xf32>
    %143 = arith.maximumf %141, %142 : vector<14x128xf32>
    %144 = vector.extract_strided_slice %143 {offsets = [0, 0], sizes = [2, 128], strides = [1, 1]} : vector<14x128xf32> to vector<2x128xf32>
    %c0_148 = arith.constant 0 : index
    %c0_149 = arith.constant 0 : index
    %c0_150 = arith.constant 0 : index
    %145 = vector.load %arg5[%c0_148, %c0_149, %c0_150] : memref<7x128x8xf32, #tpu.memory_space<vmem>>, vector<1x128x8xf32>
    %146 = vector.shape_cast %145 : vector<1x128x8xf32> to vector<128x8xf32>
    %cst_151 = arith.constant dense<0.000000e+00> : vector<2x8xf32>
    %147 = tpu.matmul %144, %146, %cst_151 {dimension_numbers = #tpu.dot_dimension_numbers<[1], [0], [0], [1], [0, 0, 1, 1], [], []>} : vector<2x128xf32>, vector<128x8xf32>, vector<2x8xf32> -> vector<2x8xf32>
    %148 = vector.extract_strided_slice %143 {offsets = [2, 0], sizes = [2, 128], strides = [1, 1]} : vector<14x128xf32> to vector<2x128xf32>
    %c1_152 = arith.constant 1 : index
    %c0_153 = arith.constant 0 : index
    %c0_154 = arith.constant 0 : index
    %149 = vector.load %arg5[%c1_152, %c0_153, %c0_154] : memref<7x128x8xf32, #tpu.memory_space<vmem>>, vector<1x128x8xf32>
    %150 = vector.shape_cast %149 : vector<1x128x8xf32> to vector<128x8xf32>
    %cst_155 = arith.constant dense<0.000000e+00> : vector<2x8xf32>
    %151 = tpu.matmul %148, %150, %cst_155 {dimension_numbers = #tpu.dot_dimension_numbers<[1], [0], [0], [1], [0, 0, 1, 1], [], []>} : vector<2x128xf32>, vector<128x8xf32>, vector<2x8xf32> -> vector<2x8xf32>
    %152 = arith.addf %147, %151 : vector<2x8xf32>
    %153 = vector.extract_strided_slice %143 {offsets = [4, 0], sizes = [2, 128], strides = [1, 1]} : vector<14x128xf32> to vector<2x128xf32>
    %c2_156 = arith.constant 2 : index
    %c0_157 = arith.constant 0 : index
    %c0_158 = arith.constant 0 : index
    %154 = vector.load %arg5[%c2_156, %c0_157, %c0_158] : memref<7x128x8xf32, #tpu.memory_space<vmem>>, vector<1x128x8xf32>
    %155 = vector.shape_cast %154 : vector<1x128x8xf32> to vector<128x8xf32>
    %cst_159 = arith.constant dense<0.000000e+00> : vector<2x8xf32>
    %156 = tpu.matmul %153, %155, %cst_159 {dimension_numbers = #tpu.dot_dimension_numbers<[1], [0], [0], [1], [0, 0, 1, 1], [], []>} : vector<2x128xf32>, vector<128x8xf32>, vector<2x8xf32> -> vector<2x8xf32>
    %157 = arith.addf %152, %156 : vector<2x8xf32>
    %158 = vector.extract_strided_slice %143 {offsets = [6, 0], sizes = [2, 128], strides = [1, 1]} : vector<14x128xf32> to vector<2x128xf32>
    %c3_160 = arith.constant 3 : index
    %c0_161 = arith.constant 0 : index
    %c0_162 = arith.constant 0 : index
    %159 = vector.load %arg5[%c3_160, %c0_161, %c0_162] : memref<7x128x8xf32, #tpu.memory_space<vmem>>, vector<1x128x8xf32>
    %160 = vector.shape_cast %159 : vector<1x128x8xf32> to vector<128x8xf32>
    %cst_163 = arith.constant dense<0.000000e+00> : vector<2x8xf32>
    %161 = tpu.matmul %158, %160, %cst_163 {dimension_numbers = #tpu.dot_dimension_numbers<[1], [0], [0], [1], [0, 0, 1, 1], [], []>} : vector<2x128xf32>, vector<128x8xf32>, vector<2x8xf32> -> vector<2x8xf32>
    %162 = arith.addf %157, %161 : vector<2x8xf32>
    %163 = vector.extract_strided_slice %143 {offsets = [8, 0], sizes = [2, 128], strides = [1, 1]} : vector<14x128xf32> to vector<2x128xf32>
    %c4 = arith.constant 4 : index
    %c0_164 = arith.constant 0 : index
    %c0_165 = arith.constant 0 : index
    %164 = vector.load %arg5[%c4, %c0_164, %c0_165] : memref<7x128x8xf32, #tpu.memory_space<vmem>>, vector<1x128x8xf32>
    %165 = vector.shape_cast %164 : vector<1x128x8xf32> to vector<128x8xf32>
    %cst_166 = arith.constant dense<0.000000e+00> : vector<2x8xf32>
    %166 = tpu.matmul %163, %165, %cst_166 {dimension_numbers = #tpu.dot_dimension_numbers<[1], [0], [0], [1], [0, 0, 1, 1], [], []>} : vector<2x128xf32>, vector<128x8xf32>, vector<2x8xf32> -> vector<2x8xf32>
    %167 = arith.addf %162, %166 : vector<2x8xf32>
    %168 = vector.extract_strided_slice %143 {offsets = [10, 0], sizes = [2, 128], strides = [1, 1]} : vector<14x128xf32> to vector<2x128xf32>
    %c5 = arith.constant 5 : index
    %c0_167 = arith.constant 0 : index
    %c0_168 = arith.constant 0 : index
    %169 = vector.load %arg5[%c5, %c0_167, %c0_168] : memref<7x128x8xf32, #tpu.memory_space<vmem>>, vector<1x128x8xf32>
    %170 = vector.shape_cast %169 : vector<1x128x8xf32> to vector<128x8xf32>
    %cst_169 = arith.constant dense<0.000000e+00> : vector<2x8xf32>
    %171 = tpu.matmul %168, %170, %cst_169 {dimension_numbers = #tpu.dot_dimension_numbers<[1], [0], [0], [1], [0, 0, 1, 1], [], []>} : vector<2x128xf32>, vector<128x8xf32>, vector<2x8xf32> -> vector<2x8xf32>
    %172 = arith.addf %167, %171 : vector<2x8xf32>
    %173 = vector.extract_strided_slice %143 {offsets = [12, 0], sizes = [2, 128], strides = [1, 1]} : vector<14x128xf32> to vector<2x128xf32>
    %c6 = arith.constant 6 : index
    %c0_170 = arith.constant 0 : index
    %c0_171 = arith.constant 0 : index
    %174 = vector.load %arg5[%c6, %c0_170, %c0_171] : memref<7x128x8xf32, #tpu.memory_space<vmem>>, vector<1x128x8xf32>
    %175 = vector.shape_cast %174 : vector<1x128x8xf32> to vector<128x8xf32>
    %cst_172 = arith.constant dense<0.000000e+00> : vector<2x8xf32>
    %176 = tpu.matmul %173, %175, %cst_172 {dimension_numbers = #tpu.dot_dimension_numbers<[1], [0], [0], [1], [0, 0, 1, 1], [], []>} : vector<2x128xf32>, vector<128x8xf32>, vector<2x8xf32> -> vector<2x8xf32>
    %177 = arith.addf %172, %176 : vector<2x8xf32>
    %178 = vector.broadcast %2 : vector<1x8xf32> to vector<2x8xf32>
    %179 = arith.addf %177, %178 : vector<2x8xf32>
    %c0_173 = arith.constant 0 : index
    %c0_174 = arith.constant 0 : index
    %180 = vector.load %arg10[%c0_173, %c0_174] : memref<2x8xf32, #tpu.memory_space<vmem>>, vector<2x8xf32>
    tpu.vector_store %arg10[%c0_173, %c0_174], %179 {strides = array<i32>} : memref<2x8xf32, #tpu.memory_space<vmem>>, vector<2x8xf32>,
    %c0_175 = arith.constant 0 : index
    %c0_176 = arith.constant 0 : index
    %181 = vector.load %arg7[%c0_175, %c0_176] : memref<8x10xf32, #tpu.memory_space<vmem>>, vector<8x10xf32>
    %cst_177 = arith.constant dense<0.000000e+00> : vector<2x10xf32>
    %182 = tpu.matmul %179, %181, %cst_177 {dimension_numbers = #tpu.dot_dimension_numbers<[1], [0], [0], [1], [0, 0, 1, 1], [], []>} : vector<2x8xf32>, vector<8x10xf32>, vector<2x10xf32> -> vector<2x10xf32>
    %183 = vector.broadcast %3 : vector<1x10xf32> to vector<2x10xf32>
    %184 = arith.addf %182, %183 : vector<2x10xf32>
    %c0_178 = arith.constant 0 : index
    %c0_179 = arith.constant 0 : index
    %185 = vector.load %arg11[%c0_178, %c0_179] : memref<2x10xf32, #tpu.memory_space<vmem>>, vector<2x10xf32>
    tpu.vector_store %arg11[%c0_178, %c0_179], %184 {strides = array<i32>} : memref<2x10xf32, #tpu.memory_space<vmem>>, vector<2x10xf32>,
    return
  }
}

</mosaic_0001>

<bundles_post_ra>
// kernel: mnist_cnn_forward.1
= control target key start
LH: loop header
LB: loop body
LE: loop exit
PB: predicated region body
PF: predicated region fallthrough
CT: control target
= control target key end

     0   :  { %17 = vsyncpa [#allocation4], 0  ;;  %vm74_vm0 = vcmask 1045504   ;;  %v4858_v5 = vmov 0.0   ;;  %vm67_vm1 = vcmask 244736   ;;  %s4846_s0 = inlined_call_operand.vmem [shape: f32[4,16,30], index: 0, kind: input, shape index: {}]   ;;  %s4847_s1 = inlined_call_operand.vmem [shape: f32[3,30,256], index: 1, kind: input, shape index: {}]   ;;  %s4848_s2 = inlined_call_operand.vmem [shape: f32[1,128], index: 2, kind: input, shape index: {}]   ;;  %s4849_s3 = inlined_call_operand.vmem [shape: f32[3,128,256], index: 3, kind: input, shape index: {}]   ;;  %s4850_s4 = inlined_call_operand.vmem [shape: f32[1,128], index: 4, kind: input, shape index: {}]   ;;  %s4851_s5 = inlined_call_operand.vmem [shape: f32[7,128,8], index: 5, kind: input, shape index: {}]   ;;  %s4852_s6 = inlined_call_operand.vmem [shape: f32[1,8], index: 6, kind: input, shape index: {}]   ;;  %s4853_s7 = inlined_call_operand.vmem [shape: f32[8,10], index: 7, kind: input, shape index: {}]   ;;  %s4854_s8 = inlined_call_operand.vmem [shape: f32[1,10], index: 8, kind: input, shape index: {}]   ;;  %s4855_s9 = inlined_call_operand.vmem [shape: f32[2,14,128], index: 9, kind: output, shape index: {0}]   ;;  %s4856_s10 = inlined_call_operand.hbm [shape: f32[2,8], index: 10, kind: output, shape index: {1}]   ;;  %s4857_s11 = inlined_call_operand.hbm [shape: f32[2,10], index: 11, kind: output, shape index: {2}]  }
   0x1   :  { %v3262_v0 = vld [vmem:[%s4847_s1 + $0x78] sm:$0x3f]  ;;  %v3267_v1 = vld [vmem:[%s4847_s1 + $0x70] sm:$0x3f]  ;;  %v3272_v2 = vld [vmem:[%s4847_s1 + $0x68] sm:$0xff]  ;;  %145 = vmatprep.mubr.f32.mxu1 %v4858_v5  ;;  %41 = vst [vmem:[#allocation2] sm:$0xff] %v4858_v5  ;;  %493 = vmatprep.mubr.f32.mxu0 %v4858_v5 }
   0x2   :  { %2527 = vmatprep.subr.msk.mxu1 %vm74_vm0, %v3262_v0  ;;  %v3279_v3 = vld [vmem:[%s4847_s1 + $0x60] sm:$0xff]  ;;  %v3286_v4 = vld [vmem:[%s4847_s1 + $0x58] sm:$0xff]  ;;  %42 = vst [vmem:[#allocation2 + $0x8] sm:$0xff] %v4858_v5  ;;  %44 = vst [vmem:[#allocation2 + $0x18] sm:$0xff] %v4858_v5 }
   0x3   :  { %2528 = vmatpush1.msk.msra.mxu1 %vm74_vm0, %v3267_v1  ;;  %v3296_v6 = vld [vmem:[%s4847_s1 + $0x50] sm:$0xff]  ;;  %v54_v7 = vld [vmem:[%s4847_s1 + $0x38] sm:$0x3f]  ;;  %v3306_v8 = vld [vmem:[%s4847_s1 + $0x48] sm:$0xff] }
   0x4   :  { %107 = vmatprep.subr.mxu1 %v3272_v2  ;;  %v53_v9 = vld [vmem:[%s4847_s1 + $0x30] sm:$0x3f]  ;;  %2553 = vmatprep.subr.msk.mxu0 %vm74_vm0, %v54_v7  ;;  %v3316_v10 = vld [vmem:[%s4847_s1 + $0x40] sm:$0xff]  ;;  %v3321_v11 = vld [vmem:[%s4847_s1 + $0x28] sm:$0xff] }
   0x5   :  { %108 = vmatpush1.msra.mxu1 %v3279_v3  ;;  %2554 = vmatpush1.msk.msra.mxu0 %vm74_vm0, %v53_v9  ;;  %v2517_v12 = vld [vmem:[%s4846_s0 + $0x10] sm:$0xff]  ;;  %v3331_v13 = vld [vmem:[%s4847_s1 + $0x20] sm:$0xff]  ;;  %v3338_v14 = vld [vmem:[%s4847_s1 + $0x18] sm:$0xff] }
   0x6   :  { %109 = vmatprep.subr.mxu1 %v3286_v4  ;;  %455 = vmatprep.subr.mxu0 %v3321_v11  ;;  %v2518_v15 = vld [vmem:[%s4846_s0 + $0x18] sm:$0x3f]  ;;  %v3353_v16 = vld [vmem:[%s4847_s1 + $0x10] sm:$0xff]  ;;  %v3359_v17 = vld [vmem:[%s4847_s1 + $0x8] sm:$0xff] }
   0x7   :  { %110 = vmatpush1.msra.mxu1 %v3296_v6  ;;  %456 = vmatpush1.msra.mxu0 %v3331_v13  ;;  %v3369_v18 = vld [vmem:[%s4847_s1] sm:$0xff]  ;;  %v2544_v20 = vld [vmem:[%s4847_s1 + $0xb8] sm:$0x3f] }
   0x8   :  { %111 = vmatprep.subr.mxu1 %v3306_v8  ;;  %457 = vmatprep.subr.mxu0 %v3338_v14  ;;  %v45_v19 = vld [vmem:[%s4846_s0] sm:$0xff] }
   0x9   :  { %112 = vmatpush1.msra.mxu1 %v3316_v10  ;;  %458 = vmatpush1.msra.mxu0 %v3353_v16 }
   0xa   :  { %2529 = vmatmul.mubr.msk.f32.vlgmr.msra.gmra.mxu1 %vm67_vm1, %v2517_v12  ;;  %2531 = vmatprep.subr.msk.mxu1 %vm74_vm0, %v54_v7 }
   0xb   :  { %2532 = vmatpush1.msk.msra.mxu1 %vm74_vm0, %v53_v9  ;;  %151 = vmatprep.mubr.f32.mxu1 %v4858_v5 }
   0xc   :  { %196 = vmatprep.subr.mxu1 %v3321_v11  ;;  %459 = vmatprep.subr.mxu0 %v3359_v17 }
   0xd   :  { %197 = vmatpush1.msra.mxu1 %v3331_v13 }
   0xe   :  { %2530 = vmatmul.mubr.msk.f32.gmra.mxu1 %vm67_vm1, %v2518_v15  ;;  %198 = vmatprep.subr.mxu1 %v3338_v14 }
   0xf   :  { %199 = vmatpush1.msra.mxu1 %v3353_v16  ;;  %234 = vmatprep.mubr.f32.mxu1 %v4858_v5 }
  0x10   :  { %18 = vsyncpa [#allocation6], 0  ;;  %200 = vmatprep.subr.mxu1 %v3359_v17  ;;  %v2543_v21 = vld [vmem:[%s4847_s1 + $0xb0] sm:$0x3f]  ;;  %460 = vmatpush1.msra.mxu0 %v3369_v18  ;;  %v3388_v22 = vld [vmem:[%s4847_s1 + $0xa8] sm:$0xff]  ;;  %vm3196_vm2 = vmmov 0  }
  0x11   :  { %201 = vmatpush1.msra.mxu1 %v3369_v18  ;;  %2555 = vmatmul.mubr.msk.f32.vlgmr.msra.gmra.mxu0 %vm67_vm1, %v2517_v12  ;;  %v3394_v23 = vld [vmem:[%s4847_s1 + $0x78] sm:$0x3f]  ;;  %v3401_v24 = vld [vmem:[%s4847_s1 + $0xa0] sm:$0xff]  ;;  %v3406_v25 = vld [vmem:[%s4847_s1 + $0x70] sm:$0x3f]  ;;  %vm2409_vm3 = vcmask 64512  }
  0x12   :  { %2533 = vmatmul.mubr.msk.f32.vlgmr.msra.gmra.mxu1 %vm67_vm1, %v45_v19  ;;  %2545 = vmatprep.subr.msk.mxu1 %vm74_vm0, %v2544_v20  ;;  %v46_v26 = vld [vmem:[%s4846_s0 + $0x8] sm:$0x3f]  ;;  %v3416_v27 = vld [vmem:[%s4847_s1 + $0x98] sm:$0xff]  ;;  %v3422_v28 = vld [vmem:[%s4847_s1 + $0x90] sm:$0xff]  ;;  %vm2400_vm4 = vcmask 58368   ;;  %s3197_s19 = smov [#allocation3]  }
  0x13   :  { %2546 = vmatpush1.msk.msra.mxu1 %vm74_vm0, %v2543_v21  ;;  %240 = vmatprep.mubr.f32.mxu1 %v4858_v5  ;;  %v3430_v29 = vld [vmem:[%s4847_s1 + $0x88] sm:$0xff]  ;;  %v3439_v30 = vld [vmem:[%s4847_s1 + $0x80] sm:$0xff]  ;;  %v3488_v33 = vld [vmem:[%s4846_s0 + $0x30] sm:$0xff]  ;;  %s2493_s20 = sshll.u32 %s3197_s19, 4  ;;  %s2494_s20 = int_to_ptr.vmem [resolvable:$true] %s2493_s20 }
  0x14   :  { %297 = vmatprep.subr.mxu1 %v3388_v22  ;;  %2576 = vmatprep.subr.msk.mxu0 %vm74_vm0, %v3394_v23  ;;  %v3446_v31 = vld [vmem:[%s4846_s0 + $0x20] sm:$0xff]  ;;  %v2536_v32 = vld [vmem:[%s4846_s0 + $0x28] sm:$0x3f]  ;;  %v626_v34 = vld [vmem:[%s4847_s1 + $0x38] sm:$0x3f]  ;;  %s3151_s21 = scalar_lea.vmem %s2494_s20, 32  ;;  %p3156_p1 = scmp.lt.s32.totalorder %s2494_s20, %s2494_s20 }
  0x15   :  { %298 = vmatpush1.msra.mxu1 %v3401_v24  ;;  %2577 = vmatpush1.msk.msra.mxu0 %vm74_vm0, %v3406_v25  ;;  %v2591_v35 = vld [vmem:[%s4847_s1 + $0xb8] sm:$0x3f]  ;;  %v625_v36 = vld [vmem:[%s4847_s1 + $0x30] sm:$0x3f]  ;;  %v815_v40 = vld [vmem:[%s4846_s0 + $0x2] sm:$0xff]  ;;  %p3152_p0 = scmp.ne.s32.totalorder %s2494_s20, %s3151_s21  ;;  %p3157_p2 = scmp.lt.s32.totalorder %s3151_s21, %s3151_s21 }
  0x16   :  { %2534 = vmatmul.mubr.msk.f32.gmra.mxu1 %vm67_vm1, %v46_v26  ;;  %299 = vmatprep.subr.mxu1 %v3416_v27  ;;  %v2590_v37 = vld [vmem:[%s4847_s1 + $0xb0] sm:$0x3f]  ;;  %v2558_v38 = vld [vmem:[%s4846_s0 + $0x38] sm:$0x3f]  ;;  %v2565_v41 = vld [vmem:[%s4846_s0 + $0x28] sm:$0x3f] }
  0x17   :  { %300 = vmatpush1.msra.mxu1 %v3422_v28  ;;  %335 = vmatprep.mubr.f32.mxu1 %v4858_v5  ;;  %v2567_v39 = vld [vmem:[%s4846_s0 + $0x38] sm:$0x3f]  ;;  %v816_v42 = vld [vmem:[%s4846_s0 + $0xa] sm:$0x3f]  ;;  %v3611_v46 = vld [vmem:[%s4849_s3 + $0x1f0] sm:$0xff]  ;;  %p3158_p3 = por %p3157_p2, %p3156_p1 }
  0x18   :  { %301 = vmatprep.subr.mxu1 %v3430_v29  ;;  %675 = vmatprep.subr.mxu0 %v3272_v2  ;;  %v2604_v43 = vld [vmem:[%s4846_s0 + $0x12] sm:$0xff]  ;;  %v2605_v44 = vld [vmem:[%s4846_s0 + $0x1a] sm:$0x3f]  ;;  %v3617_v47 = vld [vmem:[%s4849_s3 + $0x1e8] sm:$0xff] }
  0x19   :  { %302 = vmatpush1.msra.mxu1 %v3439_v30  ;;  %499 = vmatprep.mubr.f32.mxu0 %v4858_v5  ;;  %v3605_v45 = vld [vmem:[%s4849_s3 + $0x1f8] sm:$0xff]  ;;  %v3623_v48 = vld [vmem:[%s4849_s3 + $0x1e0] sm:$0xff]  ;;  %v3635_v50 = vld [vmem:[%s4849_s3 + $0x1d0] sm:$0xff]  ;;  %p3159_p4 = pnand %p3158_p3, %p3152_p0 }
  0x1a   :  { %2547 = vmatmul.mubr.msk.f32.vlgmr.msra.gmra.mxu1 %vm67_vm1, %v3446_v31  ;;  %2549 = vmatprep.subr.msk.mxu1 %vm74_vm0, %v3262_v0  ;;  %v3629_v49 = vld [vmem:[%s4849_s3 + $0x1d8] sm:$0xff]  ;;  %v3641_v51 = vld [vmem:[%s4849_s3 + $0x1c8] sm:$0xff]  ;;  %v3647_v52 = vld [vmem:[%s4849_s3 + $0x1c0] sm:$0xff] }
  0x1b   :  { %2550 = vmatpush1.msk.msra.mxu1 %vm74_vm0, %v3267_v1  ;;  %341 = vmatprep.mubr.f32.mxu1 %v4858_v5  ;;  %v3653_v53 = vld [vmem:[%s4849_s3 + $0x1b8] sm:$0xff]  ;;  %v3659_v54 = vld [vmem:[%s4849_s3 + $0x1b0] sm:$0xff]  ;;  %v3665_v55 = vld [vmem:[%s4849_s3 + $0x1a8] sm:$0xff] }
  0x1c   :  { %378 = vmatprep.subr.mxu1 %v3272_v2  ;;  %676 = vmatpush1.msra.mxu0 %v3279_v3  ;;  %v3671_v56 = vld [vmem:[%s4849_s3 + $0x1a0] sm:$0xff]  ;;  %v3677_v57 = vld [vmem:[%s4849_s3 + $0x198] sm:$0xff]  ;;  %v3683_v58 = vld [vmem:[%s4849_s3 + $0x190] sm:$0xff] }
  0x1d   :  { %379 = vmatpush1.msra.mxu1 %v3279_v3  ;;  %2556 = vmatmul.mubr.msk.f32.gmra.mxu0 %vm67_vm1, %v2518_v15  ;;  %4911 = vst [vmem:[#allocation9_spill] sm:$0xff] %v3671_v56  ;;  %4912 = vst [vmem:[#allocation10_spill] sm:$0xff] %v3677_v57  ;;  %v3689_v59 = vld [vmem:[%s4849_s3 + $0x188] sm:$0xff]  ;;  %v3695_v60 = vld [vmem:[%s4849_s3 + $0x180] sm:$0xff] }
  0x1e   :  { %2548 = vmatmul.mubr.msk.f32.gmra.mxu1 %vm67_vm1, %v2536_v32  ;;  %380 = vmatprep.subr.mxu1 %v3286_v4  ;;  %4913 = vst [vmem:[#allocation11_spill] sm:$0xff] %v3683_v58  ;;  %4914 = vst [vmem:[#allocation12_spill] sm:$0xff] %v3689_v59  ;;  %v3701_v61 = vld [vmem:[%s4849_s3 + $0x178] sm:$0xff]  ;;  %v3707_v62 = vld [vmem:[%s4849_s3 + $0x170] sm:$0xff] }
  0x1f   :  { %381 = vmatpush1.msra.mxu1 %v3296_v6  ;;  %416 = vmatprep.mubr.f32.mxu1 %v4858_v5  ;;  %4915 = vst [vmem:[#allocation13_spill] sm:$0xff] %v3695_v60  ;;  %4916 = vst [vmem:[#allocation14_spill] sm:$0xff] %v3701_v61  ;;  %v3713_v63 = vld [vmem:[%s4849_s3 + $0x168] sm:$0xff]  ;;  %v3719_v0 = vld [vmem:[%s4849_s3 + $0x160] sm:$0xff] }
  0x20   :  { %382 = vmatprep.subr.mxu1 %v3306_v8  ;;  %677 = vmatprep.subr.mxu0 %v3286_v4  ;;  %4917 = vst [vmem:[#allocation15_spill] sm:$0xff] %v3707_v62  ;;  %4918 = vst [vmem:[#allocation16_spill] sm:$0xff] %v3713_v63  ;;  %v3725_v1 = vld [vmem:[%s4849_s3 + $0x158] sm:$0xff]  ;;  %v3755_v7 = vld [vmem:[%s4849_s3 + $0x130] sm:$0xff] }
  0x21   :  { %383 = vmatpush1.msra.mxu1 %v3316_v10  ;;  %678 = vmatpush1.msra.mxu0 %v3296_v6  ;;  %4919 = vst [vmem:[#allocation17_spill] sm:$0xff] %v3719_v0  ;;  %4920 = vst [vmem:[#allocation18_spill] sm:$0xff] %v3725_v1  ;;  %v3767_v9 = vld [vmem:[%s4849_s3 + $0x120] sm:$0xff]  ;;  %v3785_v12 = vld [vmem:[%s4849_s3 + $0x108] sm:$0xff] }
  0x22   :  { %2551 = vmatmul.mubr.msk.f32.vlgmr.msra.gmra.mxu1 %vm67_vm1, %v3446_v31  ;;  %2559 = vmatprep.subr.msk.mxu1 %vm74_vm0, %v2544_v20  ;;  %4925 = vst [vmem:[#allocation23_spill] sm:$0xff] %v3755_v7  ;;  %4927 = vst [vmem:[#allocation25_spill] sm:$0xff] %v3767_v9  ;;  %v3801_v15 = vld [vmem:[%s4849_s3 + $0xf0] sm:$0xff]  ;;  %v3827_v19 = vld [vmem:[%s4849_s3 + $0xd8] sm:$0xff] }
  0x23   :  { %2560 = vmatpush1.msk.msra.mxu1 %vm74_vm0, %v2543_v21  ;;  %422 = vmatprep.mubr.f32.mxu1 %v4858_v5  ;;  %4930 = vst [vmem:[#allocation28_spill] sm:$0xff] %v3785_v12  ;;  %v3833_v20 = vld [vmem:[%s4849_s3 + $0xd0] sm:$0xff]  ;;  %v3839_v21 = vld [vmem:[%s4849_s3 + $0xc8] sm:$0xff]  ;;  %v3869_v26 = vld [vmem:[%s4849_s3 + $0xa0] sm:$0xff] }
  0x24   :  { %541 = vmatprep.subr.mxu1 %v3388_v22  ;;  %679 = vmatprep.subr.mxu0 %v3306_v8 }
  0x25   :  { %542 = vmatpush1.msra.mxu1 %v3401_v24  ;;  %680 = vmatpush1.msra.mxu0 %v3316_v10 }
  0x26   :  { %2552 = vmatmul.mubr.msk.f32.gmra.mxu1 %vm67_vm1, %v2536_v32  ;;  %543 = vmatprep.subr.mxu1 %v3416_v27  ;;  %v3905_v32 = vld [vmem:[%s4849_s3 + $0x70] sm:$0xff] }
  0x27   :  { %544 = vmatpush1.msra.mxu1 %v3422_v28  ;;  %579 = vmatprep.mubr.f32.mxu1 %v4858_v5  ;;  %4934 = vst [vmem:[#allocation32_spill] sm:$0xff] %v3905_v32 }
  0x28   :  { %545 = vmatprep.subr.mxu1 %v3430_v29  ;;  %713 = vmatprep.mubr.f32.mxu0 %v4858_v5 }
  0x29   :  { %546 = vmatpush1.msra.mxu1 %v3439_v30  ;;  %2578 = vmatmul.mubr.msk.f32.vlgmr.msra.gmra.mxu0 %vm67_vm1, %v3488_v33 }
  0x2a   :  { %2561 = vmatmul.mubr.msk.f32.vlgmr.msra.gmra.mxu1 %vm67_vm1, %v3488_v33  ;;  %2580 = vmatprep.subr.msk.mxu1 %vm74_vm0, %v626_v34 }
  0x2b   :  { %2592 = vmatprep.subr.msk.mxu0 %vm74_vm0, %v2591_v35  ;;  %2581 = vmatpush1.msk.msra.mxu1 %vm74_vm0, %v625_v36 }
  0x2c   :  { %2593 = vmatpush1.msk.msra.mxu0 %vm74_vm0, %v2590_v37  ;;  %764 = vmatprep.subr.mxu1 %v3321_v11 }
  0x2d   :  { %863 = vmatprep.subr.mxu0 %v3388_v22  ;;  %585 = vmatprep.mubr.f32.mxu1 %v4858_v5 }
  0x2e   :  { %719 = vmatprep.mubr.f32.mxu0 %v4858_v5  ;;  %765 = vmatpush1.msra.mxu1 %v3331_v13 }
  0x2f   :  { %864 = vmatpush1.msra.mxu0 %v3401_v24  ;;  %2562 = vmatmul.mubr.msk.f32.gmra.mxu1 %vm67_vm1, %v2558_v38  ;;  %v3941_v38 = vld [vmem:[%s4849_s3 + $0x40] sm:$0xff] }
  0x30   :  { %2579 = vmatmul.mubr.msk.f32.gmra.mxu0 %vm67_vm1, %v2567_v39  ;;  %766 = vmatprep.subr.mxu1 %v3338_v14  ;;  %4940 = vst [vmem:[#allocation38_spill] sm:$0xff] %v3941_v38 }
  0x31   :  { %865 = vmatprep.subr.mxu0 %v3416_v27  ;;  %767 = vmatpush1.msra.mxu1 %v3353_v16 }
  0x32   :  { %866 = vmatpush1.msra.mxu0 %v3422_v28  ;;  %768 = vmatprep.subr.mxu1 %v3359_v17 }
  0x33   :  { %867 = vmatprep.subr.mxu0 %v3430_v29  ;;  %769 = vmatpush1.msra.mxu1 %v3369_v18 }
  0x34   :  { %802 = vmatprep.mubr.f32.mxu1 %v4858_v5  ;;  %868 = vmatpush1.msra.mxu0 %v3439_v30 }
  0x35   :  { %901 = vmatprep.mubr.f32.mxu0 %v4858_v5  ;;  %2582 = vmatmul.mubr.msk.f32.vlgmr.msra.gmra.mxu1 %vm67_vm1, %v3446_v31  ;;  %v3899_v31 = vld [vmem:[%s4849_s3 + $0x78] sm:$0xff] }
  0x36   :  { %2594 = vmatmul.mubr.msk.f32.vlgmr.msra.gmra.mxu0 %vm67_vm1, %v815_v40  ;;  %2596 = vmatprep.subr.msk.mxu1 %vm74_vm0, %v3394_v23  ;;  %v3851_v23 = vld [vmem:[%s4849_s3 + $0xb8] sm:$0xff]  ;;  %4933 = vst [vmem:[#allocation31_spill] sm:$0xff] %v3899_v31 }
  0x37   :  { %2600 = vmatprep.subr.msk.mxu0 %vm74_vm0, %v626_v34  ;;  %2597 = vmatpush1.msk.msra.mxu1 %vm74_vm0, %v3406_v25  ;;  %v3863_v25 = vld [vmem:[%s4849_s3 + $0xa8] sm:$0xff]  ;;  %v3917_v34 = vld [vmem:[%s4849_s3 + $0x60] sm:$0xff] }
  0x38   :  { %2601 = vmatpush1.msk.msra.mxu0 %vm74_vm0, %v625_v36  ;;  %944 = vmatprep.subr.mxu1 %v3272_v2  ;;  %v3731_v2 = vld [vmem:[%s4849_s3 + $0x150] sm:$0xff]  ;;  %4936 = vst [vmem:[#allocation34_spill] sm:$0xff] %v3917_v34 }
  0x39   :  { %1021 = vmatprep.subr.mxu0 %v3321_v11  ;;  %808 = vmatprep.mubr.f32.mxu1 %v4858_v5  ;;  %4921 = vst [vmem:[#allocation19_spill] sm:$0xff] %v3731_v2  ;;  %v3779_v11 = vld [vmem:[%s4849_s3 + $0x110] sm:$0xff] }
  0x3a   :  { %907 = vmatprep.mubr.f32.mxu0 %v4858_v5  ;;  %945 = vmatpush1.msra.mxu1 %v3279_v3  ;;  %v3737_v3 = vld [vmem:[%s4849_s3 + $0x148] sm:$0xff]  ;;  %4929 = vst [vmem:[#allocation27_spill] sm:$0xff] %v3779_v11  ;;  %v3929_v36 = vld [vmem:[%s4849_s3 + $0x50] sm:$0xff] }
  0x3b   :  { %1022 = vmatpush1.msra.mxu0 %v3331_v13  ;;  %2583 = vmatmul.mubr.msk.f32.gmra.mxu1 %vm67_vm1, %v2565_v41  ;;  %4922 = vst [vmem:[#allocation20_spill] sm:$0xff] %v3737_v3  ;;  %v3791_v13 = vld [vmem:[%s4849_s3 + $0x100] sm:$0xff]  ;;  %4938 = vst [vmem:[#allocation36_spill] sm:$0xff] %v3929_v36  ;;  %v3959_v41 = vld [vmem:[%s4849_s3 + $0x28] sm:$0xff] }
  0x3c   :  { %2595 = vmatmul.mubr.msk.f32.gmra.mxu0 %vm67_vm1, %v816_v42  ;;  %946 = vmatprep.subr.mxu1 %v3286_v4  ;;  %v3743_v4 = vld [vmem:[%s4849_s3 + $0x140] sm:$0xff]  ;;  %4931 = vst [vmem:[#allocation29_spill] sm:$0xff] %v3791_v13  ;;  %4943 = vst [vmem:[#allocation41_spill] sm:$0xff] %v3959_v41 }
  0x3d   :  { %1023 = vmatprep.subr.mxu0 %v3338_v14  ;;  %947 = vmatpush1.msra.mxu1 %v3296_v6  ;;  %4923 = vst [vmem:[#allocation21_spill] sm:$0xff] %v3743_v4  ;;  %v3749_v6 = vld [vmem:[%s4849_s3 + $0x138] sm:$0xff] }
  0x3e   :  { %1024 = vmatpush1.msra.mxu0 %v3353_v16  ;;  %948 = vmatprep.subr.mxu1 %v3306_v8  ;;  %4924 = vst [vmem:[#allocation22_spill] sm:$0xff] %v3749_v6  ;;  %v3761_v8 = vld [vmem:[%s4849_s3 + $0x128] sm:$0xff]  ;;  %v3796_v14 = vld [vmem:[%s4849_s3 + $0xf8] sm:$0xff] }
  0x3f   :  { %1025 = vmatprep.subr.mxu0 %v3359_v17  ;;  %949 = vmatpush1.msra.mxu1 %v3316_v10  ;;  %4926 = vst [vmem:[#allocation24_spill] sm:$0xff] %v3761_v8  ;;  %v3773_v10 = vld [vmem:[%s4849_s3 + $0x118] sm:$0xff]  ;;  %v3815_v17 = vld [vmem:[%s4849_s3 + $0xe8] sm:$0xff] }
  0x40   :  { %982 = vmatprep.mubr.f32.mxu1 %v4858_v5  ;;  %1026 = vmatpush1.msra.mxu0 %v3369_v18  ;;  %4928 = vst [vmem:[#allocation26_spill] sm:$0xff] %v3773_v10  ;;  %v3807_v16 = vld [vmem:[%s4849_s3 + $0x2f8] sm:$0xff]  ;;  %v3820_v18 = vld [vmem:[%s4849_s3 + $0xe0] sm:$0xff] }
  0x41   :  { %1059 = vmatprep.mubr.f32.mxu0 %v4858_v5  ;;  %2598 = vmatmul.mubr.msk.f32.vlgmr.msra.gmra.mxu1 %vm67_vm1, %v815_v40  ;;  %4932 = vst [vmem:[#allocation30_spill] sm:$0xff] %v3807_v16  ;;  %v3953_v40 = vld [vmem:[%s4849_s3 + $0x30] sm:$0xff] }
  0x42   :  { %2602 = vmatmul.mubr.msk.f32.vlgmr.msra.gmra.mxu0 %vm67_vm1, %v3488_v33  ;;  %2606 = vmatprep.subr.msk.mxu1 %vm74_vm0, %v2591_v35  ;;  %v3911_v33 = vld [vmem:[%s4849_s3 + $0x68] sm:$0xff]  ;;  %v3923_v35 = vld [vmem:[%s4849_s3 + $0x58] sm:$0xff]  ;;  %4942 = vst [vmem:[#allocation40_spill] sm:$0xff] %v3953_v40 }
  0x43   :  { %2607 = vmatpush1.msk.msra.mxu1 %vm74_vm0, %v2590_v37  ;;  %988 = vmatprep.mubr.f32.mxu1 %v4858_v5  ;;  %4935 = vst [vmem:[#allocation33_spill] sm:$0xff] %v3911_v33  ;;  %4937 = vst [vmem:[#allocation35_spill] sm:$0xff] %v3923_v35  ;;  %v3935_v37 = vld [vmem:[%s4849_s3 + $0x48] sm:$0xff] }
  0x44   :  { %1106 = vmatprep.subr.mxu1 %v3388_v22  ;;  %1065 = vmatprep.mubr.f32.mxu0 %v4858_v5  ;;  %v3845_v22 = vld [vmem:[%s4849_s3 + $0xc0] sm:$0xff]  ;;  %4939 = vst [vmem:[#allocation37_spill] sm:$0xff] %v3935_v37 }
  0x45   :  { %1107 = vmatpush1.msra.mxu1 %v3401_v24  ;;  %1245 = vmatprep.subr.mxu0 %v3605_v45  ;;  %v3857_v24 = vld [vmem:[%s4849_s3 + $0xb0] sm:$0xff] }
  0x46   :  { %2599 = vmatmul.mubr.msk.f32.gmra.mxu1 %vm67_vm1, %v816_v42  ;;  %2603 = vmatmul.mubr.msk.f32.gmra.mxu0 %vm67_vm1, %v2567_v39  ;;  %v3947_v39 = vld [vmem:[%s4849_s3 + $0x38] sm:$0xff]  ;;  %v3965_v42 = vld [vmem:[%s4849_s3 + $0x20] sm:$0xff] }
  0x47   :  { %1108 = vmatprep.subr.mxu1 %v3416_v27  ;;  %1144 = vmatprep.mubr.f32.mxu1 %v4858_v5  ;;  %v3875_v27 = vld [vmem:[%s4849_s3 + $0x98] sm:$0xff]  ;;  %4941 = vst [vmem:[#allocation39_spill] sm:$0xff] %v3947_v39  ;;  %4944 = vst [vmem:[#allocation42_spill] sm:$0xff] %v3965_v42 }
  0x48   :  { %1109 = vmatpush1.msra.mxu1 %v3422_v28  ;;  %1309 = vmatprep.mubr.f32.mxu0 %v4858_v5  ;;  %v3881_v28 = vld [vmem:[%s4849_s3 + $0x90] sm:$0xff] }
  0x49   :  { %1110 = vmatprep.subr.mxu1 %v3430_v29  ;;  %1246 = vmatpush1.msra.mxu0 %v3611_v46  ;;  %v3887_v29 = vld [vmem:[%s4849_s3 + $0x88] sm:$0xff] }
  0x4a   :  { %1111 = vmatpush1.msra.mxu1 %v3439_v30  ;;  %1247 = vmatprep.subr.mxu0 %v3617_v47  ;;  %v3893_v30 = vld [vmem:[%s4849_s3 + $0x80] sm:$0xff] }
  0x4b   :  { %2608 = vmatmul.mubr.msk.f32.vlgmr.msra.gmra.mxu1 %vm67_vm1, %v2604_v43  ;;  %1248 = vmatpush1.msra.mxu0 %v3623_v48  ;;  %v3971_v43 = vld [vmem:[%s4849_s3 + $0x18] sm:$0xff] }
  0x4c   :  { %1150 = vmatprep.mubr.f32.mxu1 %v4858_v5  ;;  %1249 = vmatprep.subr.mxu0 %v3629_v49  ;;  %4945 = vst [vmem:[#allocation43_spill] sm:$0xff] %v3971_v43 }
  0x4d   :  { %1250 = vmatpush1.msra.mxu0 %v3635_v50  ;;  %1322 = vmatprep.subr.mxu1 %v3796_v14 }
  0x4e   :  { %1251 = vmatprep.subr.mxu0 %v3641_v51  ;;  %1323 = vmatpush1.msra.mxu1 %v3801_v15 }
  0x4f   :  { %2609 = vmatmul.mubr.msk.f32.gmra.mxu1 %vm67_vm1, %v2605_v44  ;;  %1252 = vmatpush1.msra.mxu0 %v3647_v52  ;;  %v3977_v44 = vld [vmem:[%s4849_s3 + $0x10] sm:$0xff] }
  0x50   :  { %1386 = vmatprep.mubr.f32.mxu1 %v4858_v5  ;;  %1253 = vmatprep.subr.mxu0 %v3653_v53  ;;  %4946 = vst [vmem:[#allocation44_spill] sm:$0xff] %v3977_v44  ;;  %v3983_v5 = vld [vmem:[%s4849_s3 + $0x8] sm:$0xff] }
  0x51   :  { %1254 = vmatpush1.msra.mxu0 %v3659_v54  ;;  %1324 = vmatprep.subr.mxu1 %v3815_v17  ;;  %4947 = vst [vmem:[#allocation45_spill] sm:$0xff] %v3983_v5 }
  0x52   :  { %1255 = vmatprep.subr.mxu0 %v3665_v55  ;;  %1325 = vmatpush1.msra.mxu1 %v3820_v18 }
  0x53   :  { %1256 = vmatpush1.msra.mxu0 %v3671_v56  ;;  %1326 = vmatprep.subr.mxu1 %v3827_v19 }
  0x54   :  { %1257 = vmatprep.subr.mxu0 %v3677_v57  ;;  %1327 = vmatpush1.msra.mxu1 %v3833_v20 }
  0x55   :  { %1258 = vmatpush1.msra.mxu0 %v3683_v58  ;;  %1328 = vmatprep.subr.mxu1 %v3839_v21 }
  0x56   :  { %1259 = vmatprep.subr.mxu0 %v3689_v59  ;;  %1329 = vmatpush1.msra.mxu1 %v3845_v22 }
  0x57   :  { %1260 = vmatpush1.msra.mxu0 %v3695_v60  ;;  %1330 = vmatprep.subr.mxu1 %v3851_v23 }
  0x58   :  { %1261 = vmatprep.subr.mxu0 %v3701_v61  ;;  %1331 = vmatpush1.msra.mxu1 %v3857_v24 }
  0x59   :  { %1262 = vmatpush1.msra.mxu0 %v3707_v62  ;;  %1332 = vmatprep.subr.mxu1 %v3863_v25 }
  0x5a   :  { %1263 = vmatprep.subr.mxu0 %v3713_v63  ;;  %1333 = vmatpush1.msra.mxu1 %v3869_v26 }
  0x5b   :  { %1264 = vmatpush1.msra.mxu0 %v3719_v0  ;;  %1334 = vmatprep.subr.mxu1 %v3875_v27 }
  0x5c   :  { %1265 = vmatprep.subr.mxu0 %v3725_v1  ;;  %1335 = vmatpush1.msra.mxu1 %v3881_v28 }
  0x5d   :  { %1266 = vmatpush1.msra.mxu0 %v3731_v2  ;;  %1336 = vmatprep.subr.mxu1 %v3887_v29 }
  0x5e   :  { %1267 = vmatprep.subr.mxu0 %v3737_v3  ;;  %1337 = vmatpush1.msra.mxu1 %v3893_v30 }
  0x5f   :  { %1268 = vmatpush1.msra.mxu0 %v3743_v4  ;;  %1338 = vmatprep.subr.mxu1 %v3899_v31 }
  0x60   :  { %1269 = vmatprep.subr.mxu0 %v3749_v6  ;;  %1339 = vmatpush1.msra.mxu1 %v3905_v32 }
  0x61   :  { %1270 = vmatpush1.msra.mxu0 %v3755_v7  ;;  %1340 = vmatprep.subr.mxu1 %v3911_v33 }
  0x62   :  { %1271 = vmatprep.subr.mxu0 %v3761_v8  ;;  %1341 = vmatpush1.msra.mxu1 %v3917_v34 }
  0x63   :  { %1272 = vmatpush1.msra.mxu0 %v3767_v9  ;;  %1342 = vmatprep.subr.mxu1 %v3923_v35 }
  0x64   :  { %1273 = vmatprep.subr.mxu0 %v3773_v10  ;;  %1343 = vmatpush1.msra.mxu1 %v3929_v36 }
  0x65   :  { %1274 = vmatpush1.msra.mxu0 %v3779_v11  ;;  %1344 = vmatprep.subr.mxu1 %v3935_v37 }
  0x66   :  { %1275 = vmatprep.subr.mxu0 %v3785_v12  ;;  %1345 = vmatpush1.msra.mxu1 %v3941_v38 }
  0x67   :  { %1276 = vmatpush1.msra.mxu0 %v3791_v13  ;;  %1346 = vmatprep.subr.mxu1 %v3947_v39 }
  0x68   :  { %1434 = vmatprep.subr.mxu0 %v3807_v16  ;;  %1347 = vmatpush1.msra.mxu1 %v3953_v40  ;;  %v3988_v16 = vld [vmem:[%s4849_s3] sm:$0xff] }
  0x69   :  { %1348 = vmatprep.subr.mxu1 %v3959_v41  ;;  %4948 = vst [vmem:[#allocation46_spill] sm:$0xff] %v3988_v16 }
  0x6a   :  { %1349 = vmatpush1.msra.mxu1 %v3965_v42 }
  0x6b   :  { %1350 = vmatprep.subr.mxu1 %v3971_v43 }
  0x6c   :  { %1351 = vmatpush1.msra.mxu1 %v3977_v44 }
  0x6d   :  { %1352 = vmatprep.subr.mxu1 %v3983_v5 }
  0x6e   :  { %1353 = vmatpush1.msra.mxu1 %v3988_v16 }
  0x6f   :  { %1515 = vmatprep.subr.mxu1 %v3605_v45 }
  0xca   :  { %v147_v13 = vpop.f32.mrf.mxu1 }
  0xcc   :  { %v149_v12 = vpop.f32.mrf.mxu1 }
  0xce   :  { %v153_v11 = vpop.f32.mrf.mxu1 }
  0xd0   :  { %v155_v10 = vpop.f32.mrf.mxu1 }
  0xd1   :  { %v495_v43 = vpop.f32.mrf.mxu0 }
  0xd2   :  { %v236_v9 = vpop.f32.mrf.mxu1 }
  0xd3   :  { %v497_v4 = vpop.f32.mrf.mxu0  ;;  %v237_v63 = vadd.f32 %v236_v9, %v147_v13  ;;  %v4000_v9 = vld [vmem:[%s4848_s2] ss:$0 sm:$0xff] }
  0xd4   :  { %v238_v8 = vpop.f32.mrf.mxu1 }
  0xd5   :  { %v239_v37 = vadd.f32 %v238_v8, %v149_v12  ;;  %v4030_v12 = vld [vmem:[%s4849_s3 + $0x2e0] sm:$0xff] }
  0xd6   :  { %v242_v44 = vpop.f32.mrf.mxu1 }
  0xd7   :  { %v243_v31 = vadd.f32 %v242_v44, %v153_v11 }
  0xd8   :  { %v244_v7 = vpop.f32.mrf.mxu1 }
  0xd9   :  { %v245_v56 = vadd.f32 %v244_v7, %v155_v10 }
  0xda   :  { %v337_v6 = vpop.f32.mrf.mxu1 }
  0xdb   :  { %v348_v60 = vadd.f32 %v337_v6, %v237_v63 }
  0xdc   :  { %v339_v42 = vpop.f32.mrf.mxu1 }
  0xdd   :  { %v501_v40 = vpop.f32.mrf.mxu0  ;;  %v349_v34 = vadd.f32 %v339_v42, %v239_v37 }
  0xde   :  { %v343_v41 = vpop.f32.mrf.mxu1 }
  0xdf   :  { %v503_v16 = vpop.f32.mrf.mxu0  ;;  %v350_v63 = vadd.f32 %v343_v41, %v243_v31  ;;  %v4949_v31 = vmov 0.0   ;;  %v4069_v41 = vld [vmem:[%s4849_s3 + $0x2b8] sm:$0xff] }
  0xe0   :  { %v345_v3 = vpop.f32.mrf.mxu1  ;;  %4951 = vst [vmem:[#allocation48_spill] sm:$0xff] %v4069_v41 }
  0xe1   :  { %v351_v6 = vadd.f32 %v345_v3, %v245_v56  ;;  %v4019_v56 = vld [vmem:[%s4849_s3 + $0x2e8] sm:$0xff] }
  0xe2   :  { %v418_v5 = vpop.f32.mrf.mxu1 }
  0xe3   :  { %v496_v1 = vadd.f32 %v495_v43, %v418_v5  ;;  %v4075_v43 = vld [vmem:[%s4849_s3 + $0x2b0] sm:$0xff] }
  0xe4   :  { %v420_v2 = vpop.f32.mrf.mxu1  ;;  %4952 = vst [vmem:[#allocation49_spill] sm:$0xff] %v4075_v43 }
  0xe5   :  { %v498_v62 = vadd.f32 %v497_v4, %v420_v2 }
  0xe6   :  { %v424_v39 = vpop.f32.mrf.mxu1 }
  0xe7   :  { %v502_v33 = vadd.f32 %v501_v40, %v424_v39  ;;  %v4058_v39 = vld [vmem:[%s4849_s3 + $0x2c0] sm:$0xff] }
  0xe8   :  { %v426_v45 = vpop.f32.mrf.mxu1  ;;  %4950 = vst [vmem:[#allocation47_spill] sm:$0xff] %v4058_v39 }
  0xe9   :  { %v3993_v38 = vpop.f32.mrf.mxu0  ;;  %v504_v5 = vadd.f32 %v503_v16, %v426_v45  ;;  %v4083_v45 = vld [vmem:[%s4849_s3 + $0x2a8] sm:$0xff] }
  0xea   :  { %v581_v0 = vpop.f32.mrf.mxu1  ;;  %4953 = vst [vmem:[#allocation50_spill] sm:$0xff] %v4083_v45 }
  0xeb   :  { %v592_v36 = vadd.f32 %v581_v0, %v496_v1  ;;  %v3995_v35 = vpop.f32.mrf.mxu0 }
  0xec   :  { %v583_v61 = vpop.f32.mrf.mxu1 }
  0xed   :  { %v593_v59 = vadd.f32 %v583_v61, %v498_v62  ;;  %v596_v58 = vmax.f32 %v348_v60, %v592_v36  ;;  %v4052_v36 = vld [vmem:[%s4849_s3 + $0x2c8] sm:$0xff] }
  0xef   :  { %v597_v32 = vmax.f32 %v349_v34, %v593_v59  ;;  %v587_v57 = vpop.f32.mrf.mxu1 }
  0xf0   :  { %v594_v2 = vadd.f32 %v587_v57, %v502_v33  ;;  %v4002_v0 = vpop.f32.mrf.mxu0  ;;  %v4012_v57 = vld [vmem:[%s4849_s3 + $0x2f0] sm:$0xff] }
  0xf1   :  { %v600_v1 = vmax.f32 %v596_v58, %v597_v32  ;;  %v589_v4 = vpop.f32.mrf.mxu1  ;;  %v4040_v32 = vld [vmem:[%s4849_s3 + $0x2d8] sm:$0xff]  ;;  %v4046_v33 = vld [vmem:[%s4849_s3 + $0x2d0] sm:$0xff] }
  0xf2   :  { %v595_v61 = vadd.f32 %v589_v4, %v504_v5  ;;  %v4004_v62 = vpop.f32.mrf.mxu0  ;;  %v598_v60 = vmax.f32 %v350_v63, %v594_v2  ;;  %v4089_v5 = vld [vmem:[%s4849_s3 + $0x2a0] sm:$0xff]  ;;  %v4095_v2 = vld [vmem:[%s4849_s3 + $0x298] sm:$0xff]  ;;  %v4102_v63 = vld [vmem:[%s4849_s3 + $0x290] sm:$0xff] }
  0xf3   :  { %v608_v59 = vadd.f32 %v4000_v9, %v600_v1  ;;  %4954 = vst [vmem:[#allocation51_spill] sm:$0xff] %v4089_v5  ;;  %4955 = vst [vmem:[#allocation52_spill] sm:$0xff] %v4095_v2 }
  0xf4   :  { %v599_v7 = vmax.f32 %v351_v6, %v595_v61  ;;  %4956 = vst [vmem:[#allocation53_spill] sm:$0xff] %v4102_v63 }
  0xf5   :  { %v4007_v8 = vmax.f32 %v608_v59, 0.0  ;;  %v804_v10 = vpop.f32.mrf.mxu1  ;;  %v4110_v59 = vld [vmem:[%s4849_s3 + $0x288] sm:$0xff] }
  0xf6   :  { %v601_v11 = vmax.f32 %v598_v60, %v599_v7  ;;  %v4014_v58 = vpop.f32.mrf.mxu0  ;;  %4957 = vst [vmem:[#allocation54_spill] sm:$0xff] %v4110_v59  ;;  %v4116_v60 = vld [vmem:[%s4849_s3 + $0x280] sm:$0xff] }
  0xf7   :  { %612 = vst [vmem:[%s4855_s9] sm:$0xff] %v4007_v8  ;;  %615 = vst [vmem:[#allocation2 + $0x10] sm:$0xff] %v4007_v8  ;;  %v806_v3 = vpop.f32.mrf.mxu1  ;;  %1310 = vmatmul.mubr.f32.vlgmr.msra.gmra.mxu0 %v4007_v8 }
  0xf8   :  { %v609_v13 = vadd.f32 %v4000_v9, %v601_v11  ;;  %v4033_v16 = vpop.f32.mrf.mxu0  ;;  %1435 = vmatpush1.msra.mxu0 %v4012_v57  ;;  %1315 = vmatprep.mubr.f32.mxu0 %v4949_v31  ;;  %4958 = vst [vmem:[#allocation55_spill] sm:$0xff] %v4116_v60  ;;  %v4122_v11 = vld [vmem:[%s4849_s3 + $0x278] sm:$0xff] }
  0xf9   :  { %1436 = vmatprep.subr.mxu0 %v4019_v56  ;;  %4959 = vst [vmem:[#allocation56_spill] sm:$0xff] %v4122_v11 }
  0xfa   :  { %v611_v34 = vmax.f32 %v609_v13, 0.0  ;;  %1437 = vmatpush1.msra.mxu0 %v4030_v12 }
  0xfb   :  { %v810_v37 = vpop.f32.mrf.mxu1  ;;  %1438 = vmatprep.subr.mxu0 %v4040_v32 }
  0xfc   :  { %613 = vst [vmem:[%s4855_s9 + $0x8] sm:$0x3f] %v611_v34  ;;  %616 = vst [vmem:[#allocation2 + $0x18] sm:$0x3f] %v611_v34  ;;  %v4063_v40 = vpop.f32.mrf.mxu0  ;;  %1439 = vmatpush1.msra.mxu0 %v4046_v33  ;;  %v4129_v34 = vld [vmem:[%s4849_s3 + $0x270] sm:$0xff] }
  0xfd   :  { %v812_v42 = vpop.f32.mrf.mxu1  ;;  %1440 = vmatprep.subr.mxu0 %v4052_v36 }
  0xfe   :  { %v4077_v44 = vpop.f32.mrf.mxu0  ;;  %1441 = vmatpush1.msra.mxu0 %v4058_v39 }
  0xff   :  { %1442 = vmatprep.subr.mxu0 %v4069_v41 }
 0x100   :  { %1443 = vmatpush1.msra.mxu0 %v4075_v43 }
 0x101   :  { %v984_v1 = vpop.f32.mrf.mxu1  ;;  %1444 = vmatprep.subr.mxu0 %v4083_v45  ;;  %v807_v45 = vadd.f32 %v806_v3, %v3995_v35  ;;  %v4161_v35 = vld [vmem:[%s4849_s3 + $0x248] sm:$0xff]  ;;  %v4167_v3 = vld [vmem:[%s4849_s3 + $0x240] sm:$0xff] }
 0x102   :  { %v1061_v4 = vpop.f32.mrf.mxu0  ;;  %1445 = vmatpush1.msra.mxu0 %v4089_v5  ;;  %v4141_v5 = vld [vmem:[%s4849_s3 + $0x260] sm:$0xff] }
 0x103   :  { %v986_v6 = vpop.f32.mrf.mxu1  ;;  %v4104_v61 = vld [vmem:[#allocation2 + $0x18] sm:$0x3f]  ;;  %1446 = vmatprep.subr.mxu0 %v4095_v2  ;;  %4961 = vst [vmem:[#allocation58_spill] sm:$0xff] %v4141_v5  ;;  %v1062_v41 = vadd.f32 %v1061_v4, %v984_v1  ;;  %v915_v4 = vadd.f32 %v4033_v16, %v807_v45  ;;  %v4189_v45 = vld [vmem:[%s4849_s3 + $0x228] sm:$0xff] }
 0x104   :  { %1316 = vmatmul.mubr.f32.gmra.mxu0 %v4104_v61  ;;  %v1063_v7 = vpop.f32.mrf.mxu0 }
 0x105   :  { %1447 = vmatpush1.msra.mxu0 %v4102_v63  ;;  %1498 = vmatprep.mubr.f32.mxu0 %v4949_v31  ;;  %v4135_v63 = vld [vmem:[%s4849_s3 + $0x268] sm:$0xff] }
 0x106   :  { %v990_v13 = vpop.f32.mrf.mxu1  ;;  %1448 = vmatprep.subr.mxu0 %v4110_v59  ;;  %4960 = vst [vmem:[#allocation57_spill] sm:$0xff] %v4135_v63  ;;  %v805_v59 = vadd.f32 %v804_v10, %v3993_v38  ;;  %v1067_v43 = vpop.f32.mrf.mxu0  ;;  %v1064_v38 = vadd.f32 %v1063_v7, %v986_v6  ;;  %v4175_v6 = vld [vmem:[%s4849_s3 + $0x238] sm:$0xff] }
 0x107   :  { %1449 = vmatpush1.msra.mxu0 %v4116_v60  ;;  %v4149_v60 = vld [vmem:[%s4849_s3 + $0x258] sm:$0xff]  ;;  %v1068_v7 = vadd.f32 %v1067_v43, %v990_v13  ;;  %v4195_v43 = vld [vmem:[%s4849_s3 + $0x220] sm:$0xff] }
 0x108   :  { %v992_v2 = vpop.f32.mrf.mxu1  ;;  %1450 = vmatprep.subr.mxu0 %v4122_v11  ;;  %4962 = vst [vmem:[#allocation59_spill] sm:$0xff] %v4149_v60  ;;  %v4155_v11 = vld [vmem:[%s4849_s3 + $0x250] sm:$0xff]  ;;  %v914_v1 = vadd.f32 %v4014_v58, %v805_v59  ;;  %v4201_v59 = vld [vmem:[%s4849_s3 + $0x218] sm:$0xff] }
 0x109   :  { %1451 = vmatpush1.msra.mxu0 %v4129_v34  ;;  %v4183_v58 = vld [vmem:[%s4849_s3 + $0x230] sm:$0xff] }
 0x10a   :  { %1452 = vmatprep.subr.mxu0 %v4135_v63  ;;  %v1069_v63 = vpop.f32.mrf.mxu0 }
 0x10b   :  { %v1146_v39 = vpop.f32.mrf.mxu1  ;;  %1453 = vmatpush1.msra.mxu0 %v4141_v5 }
 0x10c   :  { %v1157_v10 = vadd.f32 %v1146_v39, %v1062_v41  ;;  %1454 = vmatprep.subr.mxu0 %v4149_v60  ;;  %v811_v39 = vadd.f32 %v810_v37, %v4002_v0  ;;  %v813_v41 = vadd.f32 %v812_v42, %v4004_v62  ;;  %v1070_v0 = vadd.f32 %v1069_v63, %v992_v2 }
 0x10d   :  { %v1148_v5 = vpop.f32.mrf.mxu1  ;;  %1455 = vmatpush1.msra.mxu0 %v4155_v11 }
 0x10e   :  { %v1158_v60 = vadd.f32 %v1148_v5, %v1064_v38  ;;  %1456 = vmatprep.subr.mxu0 %v4161_v35  ;;  %v1161_v37 = vmax.f32 %v914_v1, %v1157_v10  ;;  %v916_v2 = vadd.f32 %v4063_v40, %v811_v39  ;;  %v917_v63 = vadd.f32 %v4077_v44, %v813_v41  ;;  %v4209_v38 = vld [vmem:[%s4849_s3 + $0x210] sm:$0xff]  ;;  %v4215_v10 = vld [vmem:[%s4849_s3 + $0x208] sm:$0xff] }
 0x10f   :  { %v1152_v16 = vpop.f32.mrf.mxu1  ;;  %1457 = vmatpush1.msra.mxu0 %v4167_v3 }
 0x110   :  { %v1162_v62 = vmax.f32 %v915_v4, %v1158_v60  ;;  %v1159_v42 = vadd.f32 %v1152_v16, %v1068_v7  ;;  %1458 = vmatprep.subr.mxu0 %v4175_v6  ;;  %v4222_v4 = vld [vmem:[%s4849_s3 + $0x200] sm:$0xff] }
 0x111   :  { %v1154_v5 = vpop.f32.mrf.mxu1  ;;  %1459 = vmatpush1.msra.mxu0 %v4183_v58 }
 0x112   :  { %v1165_v60 = vmax.f32 %v1161_v37, %v1162_v62  ;;  %v1160_v13 = vadd.f32 %v1154_v5, %v1070_v0  ;;  %1460 = vmatprep.subr.mxu0 %v4189_v45  ;;  %v1163_v1 = vmax.f32 %v916_v2, %v1159_v42  ;;  %v4987_v0 = vld [vmem:[#allocation42_spill] sm:$0xff]  ;;  %v4989_v62 = vld [vmem:[#allocation43_spill] sm:$0xff]  ;;  %v4991_v5 = vld [vmem:[#allocation44_spill] sm:$0xff] }
 0x113   :  { %1461 = vmatpush1.msra.mxu0 %v4195_v43  ;;  %v4988_v37 = vld [vmem:[#allocation22_spill] sm:$0xff]  ;;  %v4990_v42 = vld [vmem:[#allocation23_spill] sm:$0xff]  ;;  %v4992_v2 = vld [vmem:[#allocation24_spill] sm:$0xff] }
 0x114   :  { %v1167_v40 = vadd.f32 %v4000_v9, %v1165_v60  ;;  %v1164_v44 = vmax.f32 %v917_v63, %v1160_v13  ;;  %1462 = vmatprep.subr.mxu0 %v4201_v59  ;;  %v4993_v63 = vld [vmem:[#allocation45_spill] sm:$0xff]  ;;  %v4995_v13 = vld [vmem:[#allocation46_spill] sm:$0xff] }
 0x115   :  { %1463 = vmatpush1.msra.mxu0 %v4209_v38  ;;  %v4994_v60 = vld [vmem:[#allocation25_spill] sm:$0xff] }
 0x116   :  { %v4225_v39 = vmax.f32 %v1167_v40, 0.0  ;;  %v1166_v41 = vmax.f32 %v1163_v1, %v1164_v44  ;;  %1464 = vmatprep.subr.mxu0 %v4215_v10  ;;  %v4996_v40 = vld [vmem:[#allocation26_spill] sm:$0xff]  ;;  %v4997_v1 = vld [vmem:[#allocation27_spill] sm:$0xff]  ;;  %v4998_v44 = vld [vmem:[#allocation28_spill] sm:$0xff] }
 0x117   :  { %1465 = vmatpush1.msra.mxu0 %v4222_v4 }
 0x118   :  { %2610 = vst [vmem:[%s4855_s9 + $0x10] sm:$0xff] %v4225_v39  ;;  %1174 = vst [vmem:[#allocation2 + $0x2] sm:$0xff] %v4225_v39  ;;  %v1168_v7 = vadd.f32 %v4000_v9, %v1166_v41  ;;  %1499 = vmatmul.mubr.f32.vlgmr.msra.gmra.mxu0 %v4225_v39  ;;  %1592 = vmatprep.subr.mxu0 %v3796_v14  ;;  %v4986_v9 = vld [vmem:[#allocation21_spill] sm:$0xff] }
 0x119   :  { %1593 = vmatpush1.msra.mxu0 %v3801_v15  ;;  %1504 = vmatprep.mubr.f32.mxu0 %v4949_v31  ;;  %v4999_v41 = vld [vmem:[#allocation29_spill] sm:$0xff] }
 0x11a   :  { %v1170_v16 = vmax.f32 %v1168_v7, 0.0  ;;  %1594 = vmatprep.subr.mxu0 %v3815_v17  ;;  %v5000_v7 = vld [vmem:[#allocation30_spill] sm:$0xff] }
 0x11b   :  { %1595 = vmatpush1.msra.mxu0 %v3820_v18  ;;  %v4973_v18 = vld [vmem:[#allocation14_spill] sm:$0xff] }
 0x11c   :  { %2611 = vst [vmem:[%s4855_s9 + $0x18] sm:$0x3f] %v1170_v16  ;;  %1175 = vst [vmem:[#allocation2 + $0xa] sm:$0x3f] %v1170_v16  ;;  %1596 = vmatprep.subr.mxu0 %v3827_v19  ;;  %v4974_v19 = vld [vmem:[#allocation36_spill] sm:$0xff]  ;;  %v5007_v16 = vld [vmem:[#allocation53_spill] sm:$0xff] }
 0x11d   :  { %1597 = vmatpush1.msra.mxu0 %v3833_v20  ;;  %v4975_v20 = vld [vmem:[#allocation15_spill] sm:$0xff] }
 0x11e   :  { %1598 = vmatprep.subr.mxu0 %v3839_v21  ;;  %v4976_v21 = vld [vmem:[#allocation37_spill] sm:$0xff] }
 0x11f   :  { %v1176_v14 = vld [vmem:[#allocation2] sm:$0xff]  ;;  %1599 = vmatpush1.msra.mxu0 %v3845_v22 }
 0x120   :  { %1387 = vmatmul.mubr.f32.vlgmr.msra.gmra.mxu1 %v1176_v14  ;;  %1600 = vmatprep.subr.mxu0 %v3851_v23  ;;  %v4977_v22 = vld [vmem:[#allocation16_spill] sm:$0xff]  ;;  %v4978_v23 = vld [vmem:[#allocation17_spill] sm:$0xff] }
 0x121   :  { %1516 = vmatpush1.msra.mxu1 %v3611_v46  ;;  %1392 = vmatprep.mubr.f32.mxu1 %v4949_v31  ;;  %v4963_v46 = vld [vmem:[#allocation9_spill] sm:$0xff]  ;;  %v5010_v14 = vld [vmem:[#allocation56_spill] sm:$0xff] }
 0x122   :  { %1517 = vmatprep.subr.mxu1 %v3617_v47  ;;  %1601 = vmatpush1.msra.mxu0 %v3857_v24  ;;  %v4964_v47 = vld [vmem:[#allocation31_spill] sm:$0xff]  ;;  %v4979_v24 = vld [vmem:[#allocation38_spill] sm:$0xff] }
 0x123   :  { %1518 = vmatpush1.msra.mxu1 %v3623_v48  ;;  %v1177_v15 = vld [vmem:[#allocation2 + $0x8] sm:$0x3f]  ;;  %1602 = vmatprep.subr.mxu0 %v3863_v25 }
 0x124   :  { %v4254_v17 = vld [vmem:[#allocation2 + $0xa] sm:$0x3f]  ;;  %1519 = vmatprep.subr.mxu1 %v3629_v49  ;;  %1393 = vmatmul.mubr.f32.gmra.mxu1 %v1177_v15  ;;  %v4966_v49 = vld [vmem:[#allocation32_spill] sm:$0xff] }
 0x125   :  { %1520 = vmatpush1.msra.mxu1 %v3635_v50  ;;  %1505 = vmatmul.mubr.f32.gmra.mxu0 %v4254_v17  ;;  %v4965_v48 = vld [vmem:[#allocation10_spill] sm:$0xff]  ;;  %v4967_v50 = vld [vmem:[#allocation11_spill] sm:$0xff] }
 0x126   :  { %1521 = vmatprep.subr.mxu1 %v3641_v51  ;;  %1603 = vmatpush1.msra.mxu0 %v3869_v26  ;;  %v4968_v51 = vld [vmem:[#allocation33_spill] sm:$0xff]  ;;  %v4980_v25 = vld [vmem:[#allocation18_spill] sm:$0xff]  ;;  %v4981_v26 = vld [vmem:[#allocation39_spill] sm:$0xff] }
 0x127   :  { %1522 = vmatpush1.msra.mxu1 %v3647_v52  ;;  %1604 = vmatprep.subr.mxu0 %v3875_v27  ;;  %v4969_v52 = vld [vmem:[#allocation12_spill] sm:$0xff]  ;;  %v4982_v27 = vld [vmem:[#allocation19_spill] sm:$0xff]  ;;  %v5012_v15 = vld [vmem:[#allocation58_spill] sm:$0xff] }
 0x128   :  { %1523 = vmatprep.subr.mxu1 %v3653_v53  ;;  %1605 = vmatpush1.msra.mxu0 %v3881_v28  ;;  %v4970_v53 = vld [vmem:[#allocation34_spill] sm:$0xff]  ;;  %v4983_v28 = vld [vmem:[#allocation40_spill] sm:$0xff] }
 0x129   :  { %1524 = vmatpush1.msra.mxu1 %v3659_v54  ;;  %1606 = vmatprep.subr.mxu0 %v3887_v29  ;;  %v4971_v54 = vld [vmem:[#allocation13_spill] sm:$0xff]  ;;  %v4984_v29 = vld [vmem:[#allocation20_spill] sm:$0xff] }
 0x12a   :  { %1525 = vmatprep.subr.mxu1 %v3665_v55  ;;  %1607 = vmatpush1.msra.mxu0 %v3893_v30  ;;  %v4972_v55 = vld [vmem:[#allocation35_spill] sm:$0xff]  ;;  %v4985_v30 = vld [vmem:[#allocation41_spill] sm:$0xff] }
 0x12b   :  { %1526 = vmatpush1.msra.mxu1 %v4963_v46  ;;  %1608 = vmatprep.subr.mxu0 %v4964_v47  ;;  %v1778_v46 = vld [vmem:[%s4851_s5 + $0x50] sm:$0xff] }
 0x12c   :  { %1527 = vmatprep.subr.mxu1 %v4965_v48  ;;  %1609 = vmatpush1.msra.mxu0 %v4966_v49  ;;  %v2687_v47 = vld [vmem:[%s4851_s5 + $0xd0] sm:$0xff]  ;;  %v1777_v48 = vld [vmem:[%s4851_s5 + $0x48] sm:$0xff] }
 0x12d   :  { %1528 = vmatpush1.msra.mxu1 %v4967_v50  ;;  %1610 = vmatprep.subr.mxu0 %v4968_v51  ;;  %v2686_v49 = vld [vmem:[%s4851_s5 + $0xc8] sm:$0xff]  ;;  %v1776_v50 = vld [vmem:[%s4851_s5 + $0x40] sm:$0xff] }
 0x12e   :  { %1529 = vmatprep.subr.mxu1 %v4969_v52  ;;  %1611 = vmatpush1.msra.mxu0 %v4970_v53  ;;  %v2685_v51 = vld [vmem:[%s4851_s5 + $0xc0] sm:$0xff]  ;;  %v1775_v52 = vld [vmem:[%s4851_s5 + $0x38] sm:$0xff] }
 0x12f   :  { %1530 = vmatpush1.msra.mxu1 %v4971_v54  ;;  %1612 = vmatprep.subr.mxu0 %v4972_v55  ;;  %v2684_v53 = vld [vmem:[%s4851_s5 + $0xb8] sm:$0xff]  ;;  %v1774_v54 = vld [vmem:[%s4851_s5 + $0x30] sm:$0xff] }
 0x130   :  { %1531 = vmatprep.subr.mxu1 %v4973_v18  ;;  %1613 = vmatpush1.msra.mxu0 %v4974_v19  ;;  %v2683_v55 = vld [vmem:[%s4851_s5 + $0xb0] sm:$0xff]  ;;  %v1773_v18 = vld [vmem:[%s4851_s5 + $0x28] sm:$0xff] }
 0x131   :  { %1532 = vmatpush1.msra.mxu1 %v4975_v20  ;;  %1614 = vmatprep.subr.mxu0 %v4976_v21  ;;  %v2682_v19 = vld [vmem:[%s4851_s5 + $0xa8] sm:$0xff]  ;;  %v1772_v20 = vld [vmem:[%s4851_s5 + $0x20] sm:$0xff] }
 0x132   :  { %1533 = vmatprep.subr.mxu1 %v4977_v22  ;;  %1579 = vmatprep.mubr.f32.mxu1 %v4949_v31  ;;  %v2681_v21 = vld [vmem:[%s4851_s5 + $0xa0] sm:$0xff]  ;;  %v1771_v22 = vld [vmem:[%s4851_s5 + $0x18] sm:$0xff] }
 0x133   :  { %1534 = vmatpush1.msra.mxu1 %v4978_v23  ;;  %1615 = vmatpush1.msra.mxu0 %v4979_v24  ;;  %v2680_v23 = vld [vmem:[%s4851_s5 + $0x98] sm:$0xff]  ;;  %v1770_v24 = vld [vmem:[%s4851_s5 + $0x10] sm:$0xff] }
 0x134   :  { %1535 = vmatprep.subr.mxu1 %v4980_v25  ;;  %1616 = vmatprep.subr.mxu0 %v4981_v26  ;;  %v2679_v25 = vld [vmem:[%s4851_s5 + $0x90] sm:$0xff]  ;;  %v1769_v26 = vld [vmem:[%s4851_s5 + $0x8] sm:$0xff] }
 0x135   :  { %1536 = vmatpush1.msra.mxu1 %v4982_v27  ;;  %1617 = vmatpush1.msra.mxu0 %v4983_v28  ;;  %v2678_v27 = vld [vmem:[%s4851_s5 + $0x88] sm:$0xff]  ;;  %v1768_v28 = vld [vmem:[%s4851_s5] sm:$0xff] }
 0x136   :  { %1537 = vmatprep.subr.mxu1 %v4984_v29  ;;  %1618 = vmatprep.subr.mxu0 %v4985_v30  ;;  %v2677_v29 = vld [vmem:[%s4851_s5 + $0x80] sm:$0xff] }
 0x137   :  { %1538 = vmatpush1.msra.mxu1 %v4986_v9  ;;  %1619 = vmatpush1.msra.mxu0 %v4987_v0 }
 0x138   :  { %1539 = vmatprep.subr.mxu1 %v4988_v37  ;;  %1620 = vmatprep.subr.mxu0 %v4989_v62 }
 0x139   :  { %1540 = vmatpush1.msra.mxu1 %v4990_v42  ;;  %1621 = vmatpush1.msra.mxu0 %v4991_v5 }
 0x13a   :  { %1541 = vmatprep.subr.mxu1 %v4992_v2  ;;  %1622 = vmatprep.subr.mxu0 %v4993_v63 }
 0x13b   :  { %1542 = vmatpush1.msra.mxu1 %v4994_v60  ;;  %1623 = vmatpush1.msra.mxu0 %v4995_v13 }
 0x13c   :  { %1543 = vmatprep.subr.mxu1 %v4996_v40  ;;  %1656 = vmatprep.mubr.f32.mxu0 %v4949_v31 }
 0x13d   :  { %1544 = vmatpush1.msra.mxu1 %v4997_v1  ;;  %1657 = vmatmul.mubr.f32.vlgmr.msra.gmra.mxu0 %v4007_v8  ;;  %v5001_v8 = vld [vmem:[#allocation47_spill] sm:$0xff] }
 0x13e   :  { %1545 = vmatprep.subr.mxu1 %v4998_v44  ;;  %1662 = vmatprep.mubr.f32.mxu0 %v4949_v31 }
 0x13f   :  { %1546 = vmatpush1.msra.mxu1 %v4999_v41  ;;  %2897 = vmatprep.subr.mxu0 %v4949_v31 }
 0x140   :  { %1580 = vmatmul.mubr.f32.vlgmr.msra.gmra.mxu1 %v4225_v39  ;;  %1671 = vmatprep.subr.mxu1 %v5000_v7  ;;  %v5003_v39 = vld [vmem:[#allocation49_spill] sm:$0xff] }
 0x141   :  { %1672 = vmatpush1.msra.mxu1 %v4012_v57  ;;  %1585 = vmatprep.mubr.f32.mxu1 %v4949_v31  ;;  %v5002_v57 = vld [vmem:[#allocation48_spill] sm:$0xff] }
 0x142   :  { %1673 = vmatprep.subr.mxu1 %v4019_v56  ;;  %1663 = vmatmul.mubr.f32.gmra.mxu0 %v4104_v61  ;;  %v5004_v56 = vld [vmem:[#allocation50_spill] sm:$0xff]  ;;  %v5005_v61 = vld [vmem:[#allocation51_spill] sm:$0xff] }
 0x143   :  { %1674 = vmatpush1.msra.mxu1 %v4030_v12  ;;  %v5006_v12 = vld [vmem:[#allocation52_spill] sm:$0xff]  ;;  %2929 = vmatprep.mubr.msk.f32.mxu0 %vm3196_vm2, %v4949_v31 }
 0x144   :  { %1586 = vmatmul.mubr.f32.gmra.mxu1 %v4254_v17  ;;  %1675 = vmatprep.subr.mxu1 %v4040_v32  ;;  %v5008_v32 = vld [vmem:[#allocation54_spill] sm:$0xff]  ;;  %v5013_v17 = vld [vmem:[#allocation59_spill] sm:$0xff] }
 0x145   :  { %1676 = vmatpush1.msra.mxu1 %v4046_v33  ;;  %1735 = vmatprep.mubr.f32.mxu1 %v4949_v31  ;;  %v5009_v33 = vld [vmem:[#allocation55_spill] sm:$0xff] }
 0x146   :  { %1677 = vmatprep.subr.mxu1 %v4052_v36  ;;  %v5011_v36 = vld [vmem:[#allocation57_spill] sm:$0xff] }
 0x147   :  { %1678 = vmatpush1.msra.mxu1 %v5001_v8 }
 0x148   :  { %1679 = vmatprep.subr.mxu1 %v5002_v57 }
 0x149   :  { %1680 = vmatpush1.msra.mxu1 %v5003_v39 }
 0x14a   :  { %1681 = vmatprep.subr.mxu1 %v5004_v56 }
 0x14b   :  { %1682 = vmatpush1.msra.mxu1 %v5005_v61 }
 0x14c   :  { %1683 = vmatprep.subr.mxu1 %v5006_v12 }
 0x14d   :  { %1684 = vmatpush1.msra.mxu1 %v5007_v16 }
 0x14e   :  { %1685 = vmatprep.subr.mxu1 %v5008_v32 }
 0x14f   :  { %1686 = vmatpush1.msra.mxu1 %v5009_v33 }
 0x150   :  { %1687 = vmatprep.subr.mxu1 %v5010_v14 }
 0x151   :  { %1688 = vmatpush1.msra.mxu1 %v4129_v34  ;;  %v1670_v34 = vld [vmem:[#allocation2 + $0x1a] sm:$0x3f] }
 0x152   :  { %1689 = vmatprep.subr.mxu1 %v5011_v36 }
 0x153   :  { %1690 = vmatpush1.msra.mxu1 %v5012_v15 }
 0x154   :  { %1691 = vmatprep.subr.mxu1 %v5013_v17 }
 0x155   :  { %1692 = vmatpush1.msra.mxu1 %v4155_v11  ;;  %v1669_v11 = vld [vmem:[#allocation2 + $0x12] sm:$0xff] }
 0x156   :  { %1693 = vmatprep.subr.mxu1 %v4161_v35  ;;  %v1783_v35 = vld [vmem:[%s4851_s5 + $0x78] sm:$0xff] }
 0x157   :  { %1694 = vmatpush1.msra.mxu1 %v4167_v3  ;;  %v2692_v3 = vld [vmem:[%s4851_s5 + $0xf8] sm:$0xff] }
 0x158   :  { %1695 = vmatprep.subr.mxu1 %v4175_v6  ;;  %v1782_v6 = vld [vmem:[%s4851_s5 + $0x70] sm:$0xff]  ;;  %2898 = vmatpush3.msra.mxu0 %v2692_v3 }
 0x159   :  { %1696 = vmatpush1.msra.mxu1 %v4183_v58  ;;  %v2691_v58 = vld [vmem:[%s4851_s5 + $0xf0] sm:$0xff]  ;;  %2899 = vmatprep.subr.mxu0 %v4949_v31 }
 0x15a   :  { %1697 = vmatprep.subr.mxu1 %v4189_v45  ;;  %v1781_v45 = vld [vmem:[%s4851_s5 + $0x68] sm:$0xff]  ;;  %2900 = vmatpush3.msra.mxu0 %v2691_v58 }
 0x15b   :  { %1698 = vmatpush1.msra.mxu1 %v4195_v43  ;;  %v2690_v43 = vld [vmem:[%s4851_s5 + $0xe8] sm:$0xff]  ;;  %2901 = vmatprep.subr.mxu0 %v4949_v31 }
 0x15c   :  { %1699 = vmatprep.subr.mxu1 %v4201_v59  ;;  %v1780_v59 = vld [vmem:[%s4851_s5 + $0x60] sm:$0xff]  ;;  %2902 = vmatpush3.msra.mxu0 %v2690_v43 }
 0x15d   :  { %1700 = vmatpush1.msra.mxu1 %v4209_v38  ;;  %v2689_v38 = vld [vmem:[%s4851_s5 + $0xe0] sm:$0xff]  ;;  %2903 = vmatprep.subr.mxu0 %v4949_v31 }
 0x15e   :  { %1701 = vmatprep.subr.mxu1 %v4215_v10  ;;  %v1779_v10 = vld [vmem:[%s4851_s5 + $0x58] sm:$0xff]  ;;  %2904 = vmatpush3.msra.mxu0 %v2689_v38 }
 0x15f   :  { %1702 = vmatpush1.msra.mxu1 %v4222_v4  ;;  %v2688_v4 = vld [vmem:[%s4851_s5 + $0xd8] sm:$0xff]  ;;  %2905 = vmatprep.subr.mxu0 %v4949_v31 }
 0x160   :  { %1736 = vmatmul.mubr.f32.vlgmr.msra.gmra.mxu1 %v1669_v11  ;;  %2932 = vmatprep.subr.mxu1 %v4949_v31 }
 0x161   :  { %1741 = vmatprep.mubr.f32.mxu1 %v4949_v31  ;;  %2933 = vmatpush3.msra.mxu1 %v1783_v35 }
 0x162   :  { %2934 = vmatprep.subr.mxu1 %v4949_v31  ;;  %2906 = vmatpush3.msra.mxu0 %v2688_v4  ;;  %v2676_v4 = vld [vmem:[%s4850_s4] ss:$0 sm:$0xff] }
 0x163   :  { %2935 = vmatpush3.msra.mxu1 %v1782_v6  ;;  %2907 = vmatprep.subr.mxu0 %v4949_v31 }
 0x164   :  { %1742 = vmatmul.mubr.f32.gmra.mxu1 %v1670_v34  ;;  %2936 = vmatprep.subr.mxu1 %v4949_v31 }
 0x165   :  { %2937 = vmatpush3.msra.mxu1 %v1781_v45  ;;  %2908 = vmatpush3.msra.mxu0 %v2687_v47 }
 0x166   :  { %2938 = vmatprep.subr.mxu1 %v4949_v31  ;;  %2909 = vmatprep.subr.mxu0 %v4949_v31 }
 0x167   :  { %2939 = vmatpush3.msra.mxu1 %v1780_v59  ;;  %2910 = vmatpush3.msra.mxu0 %v2686_v49 }
 0x168   :  { %2940 = vmatprep.subr.mxu1 %v4949_v31  ;;  %2911 = vmatprep.subr.mxu0 %v4949_v31 }
 0x169   :  { %2941 = vmatpush3.msra.mxu1 %v1779_v10  ;;  %2912 = vmatpush3.msra.mxu0 %v2685_v51 }
 0x16a   :  { %2942 = vmatprep.subr.mxu1 %v4949_v31  ;;  %2913 = vmatprep.subr.mxu0 %v4949_v31 }
 0x16b   :  { %2943 = vmatpush3.msra.mxu1 %v1778_v46  ;;  %2914 = vmatpush3.msra.mxu0 %v2684_v53 }
 0x16c   :  { %2944 = vmatprep.subr.mxu1 %v4949_v31  ;;  %2915 = vmatprep.subr.mxu0 %v4949_v31 }
 0x16d   :  { %2945 = vmatpush3.msra.mxu1 %v1777_v48  ;;  %2916 = vmatpush3.msra.mxu0 %v2683_v55 }
 0x16e   :  { %2946 = vmatprep.subr.mxu1 %v4949_v31  ;;  %2917 = vmatprep.subr.mxu0 %v4949_v31 }
 0x16f   :  { %2947 = vmatpush3.msra.mxu1 %v1776_v50  ;;  %2918 = vmatpush3.msra.mxu0 %v2682_v19  ;;  %v2708_v19 = vld [vmem:[%s4851_s5 + $0x178] sm:$0xff] }
 0x170   :  { %2948 = vmatprep.subr.mxu1 %v4949_v31  ;;  %2919 = vmatprep.subr.mxu0 %v4949_v31 }
 0x171   :  { %2949 = vmatpush3.msra.mxu1 %v1775_v52  ;;  %2920 = vmatpush3.msra.mxu0 %v2681_v21  ;;  %v2707_v21 = vld [vmem:[%s4851_s5 + $0x170] sm:$0xff] }
 0x172   :  { %2950 = vmatprep.subr.mxu1 %v4949_v31  ;;  %2921 = vmatprep.subr.mxu0 %v4949_v31 }
 0x173   :  { %2951 = vmatpush3.msra.mxu1 %v1774_v54  ;;  %2922 = vmatpush3.msra.mxu0 %v2680_v23  ;;  %v2724_v54 = vld [vmem:[%s4851_s5 + $0x1f8] sm:$0xff]  ;;  %v2706_v23 = vld [vmem:[%s4851_s5 + $0x168] sm:$0xff] }
 0x174   :  { %2952 = vmatprep.subr.mxu1 %v4949_v31  ;;  %2923 = vmatprep.subr.mxu0 %v4949_v31 }
 0x175   :  { %2953 = vmatpush3.msra.mxu1 %v1773_v18  ;;  %2924 = vmatpush3.msra.mxu0 %v2679_v25  ;;  %v2705_v25 = vld [vmem:[%s4851_s5 + $0x160] sm:$0xff] }
 0x176   :  { %2954 = vmatprep.subr.mxu1 %v4949_v31  ;;  %2925 = vmatprep.subr.mxu0 %v4949_v31 }
 0x177   :  { %2955 = vmatpush3.msra.mxu1 %v1772_v20  ;;  %2926 = vmatpush3.msra.mxu0 %v2678_v27  ;;  %v2723_v20 = vld [vmem:[%s4851_s5 + $0x1f0] sm:$0xff]  ;;  %v2704_v27 = vld [vmem:[%s4851_s5 + $0x158] sm:$0xff] }
 0x178   :  { %2956 = vmatprep.subr.mxu1 %v4949_v31  ;;  %2927 = vmatprep.subr.mxu0 %v4949_v31 }
 0x179   :  { %2957 = vmatpush3.msra.mxu1 %v1771_v22  ;;  %2964 = vmatprep.mubr.msk.f32.mxu1 %vm3196_vm2, %v4949_v31  ;;  %v2722_v22 = vld [vmem:[%s4851_s5 + $0x1e8] sm:$0xff] }
 0x17a   :  { %2958 = vmatprep.subr.mxu1 %v4949_v31  ;;  %2928 = vmatpush3.msra.mxu0 %v2677_v29  ;;  %v2703_v29 = vld [vmem:[%s4851_s5 + $0x150] sm:$0xff] }
 0x17b   :  { %2959 = vmatpush3.msra.mxu1 %v1770_v24  ;;  %2967 = vmatprep.subr.mxu0 %v4949_v31  ;;  %v2721_v24 = vld [vmem:[%s4851_s5 + $0x1e0] sm:$0xff] }
 0x17c   :  { %2960 = vmatprep.subr.mxu1 %v4949_v31 }
 0x17d   :  { %2961 = vmatpush3.msra.mxu1 %v1769_v26  ;;  %v2720_v26 = vld [vmem:[%s4851_s5 + $0x1d8] sm:$0xff] }
 0x17e   :  { %2962 = vmatprep.subr.mxu1 %v4949_v31 }
 0x17f   :  { %2963 = vmatpush3.msra.mxu1 %v1768_v28  ;;  %v2719_v28 = vld [vmem:[%s4851_s5 + $0x1d0] sm:$0xff] }
 0x180   :  { %3002 = vmatprep.subr.mxu1 %v4949_v31 }
 0x1b7   :  { %v1311_v30 = vpop.f32.mrf.mxu0 }
 0x1b9   :  { %v1313_v9 = vpop.f32.mrf.mxu0 }
 0x1c4   :  { %v1317_v0 = vpop.f32.mrf.mxu0 }
 0x1c6   :  { %v1319_v37 = vpop.f32.mrf.mxu0 }
 0x1d8   :  { %v1500_v62 = vpop.f32.mrf.mxu0 }
 0x1da   :  { %v1502_v5 = vpop.f32.mrf.mxu0 }
 0x1e0   :  { %v1388_v42 = vpop.f32.mrf.mxu1 }
 0x1e1   :  { %v1389_v32 = vadd.f32 %v1388_v42, %v1311_v30  ;;  %v2718_v30 = vld [vmem:[%s4851_s5 + $0x1c8] sm:$0xff]  ;;  %v2700_v42 = vld [vmem:[%s4851_s5 + $0x138] sm:$0xff] }
 0x1e2   :  { %v1390_v2 = vpop.f32.mrf.mxu1 }
 0x1e3   :  { %v1391_v33 = vadd.f32 %v1390_v2, %v1313_v9  ;;  %v1511_v35 = vadd.f32 %v1500_v62, %v1389_v32  ;;  %v2702_v9 = vld [vmem:[%s4851_s5 + $0x148] sm:$0xff]  ;;  %v2716_v62 = vld [vmem:[%s4851_s5 + $0x1b8] sm:$0xff]  ;;  %v2699_v2 = vld [vmem:[%s4851_s5 + $0x130] sm:$0xff] }
 0x1e4   :  { %v1394_v63 = vpop.f32.mrf.mxu1  ;;  %v2740_v32 = vld [vmem:[%s4851_s5 + $0x278] sm:$0xff] }
 0x1e5   :  { %v1395_v60 = vadd.f32 %v1394_v63, %v1317_v0  ;;  %v1506_v13 = vpop.f32.mrf.mxu0  ;;  %v1512_v3 = vadd.f32 %v1502_v5, %v1391_v33  ;;  %v2717_v0 = vld [vmem:[%s4851_s5 + $0x1c0] sm:$0xff]  ;;  %v2715_v5 = vld [vmem:[%s4851_s5 + $0x1b0] sm:$0xff]  ;;  %v2714_v63 = vld [vmem:[%s4851_s5 + $0x1a8] sm:$0xff] }
 0x1e6   :  { %v1396_v40 = vpop.f32.mrf.mxu1  ;;  %v2755_v33 = vld [vmem:[%s4851_s5 + $0x2f0] sm:$0xff] }
 0x1e7   :  { %v1397_v1 = vadd.f32 %v1396_v40, %v1319_v37  ;;  %v1513_v44 = vadd.f32 %v1506_v13, %v1395_v60  ;;  %v1508_v41 = vpop.f32.mrf.mxu0  ;;  %v2701_v37 = vld [vmem:[%s4851_s5 + $0x140] sm:$0xff]  ;;  %v2698_v60 = vld [vmem:[%s4851_s5 + $0x128] sm:$0xff] }
 0x1e8   :  { %v2713_v13 = vld [vmem:[%s4851_s5 + $0x1a0] sm:$0xff] }
 0x1e9   :  { %v1514_v7 = vadd.f32 %v1508_v41, %v1397_v1  ;;  %v2697_v40 = vld [vmem:[%s4851_s5 + $0x120] sm:$0xff]  ;;  %v2712_v1 = vld [vmem:[%s4851_s5 + $0x198] sm:$0xff]  ;;  %v2711_v41 = vld [vmem:[%s4851_s5 + $0x190] sm:$0xff] }
 0x1fd   :  { %v1658_v39 = vpop.f32.mrf.mxu0 }
 0x1ff   :  { %v1660_v61 = vpop.f32.mrf.mxu0 }
 0x200   :  { %v1581_v8 = vpop.f32.mrf.mxu1 }
 0x201   :  { %v1659_v14 = vadd.f32 %v1658_v39, %v1581_v8  ;;  %v2710_v8 = vld [vmem:[%s4851_s5 + $0x188] sm:$0xff]  ;;  %v2709_v39 = vld [vmem:[%s4851_s5 + $0x180] sm:$0xff] }
 0x202   :  { %v1583_v57 = vpop.f32.mrf.mxu1  ;;  %v1664_v16 = vpop.f32.mrf.mxu0 }
 0x203   :  { %v1661_v15 = vadd.f32 %v1660_v61, %v1583_v57  ;;  %v2694_v57 = vld [vmem:[%s4851_s5 + $0x108] sm:$0xff]  ;;  %v2693_v61 = vld [vmem:[%s4851_s5 + $0x100] sm:$0xff] }
 0x204   :  { %v1587_v56 = vpop.f32.mrf.mxu1  ;;  %v1666_v11 = vpop.f32.mrf.mxu0 }
 0x205   :  { %v1665_v6 = vadd.f32 %v1664_v16, %v1587_v56 }
 0x206   :  { %v1589_v12 = vpop.f32.mrf.mxu1 }
 0x207   :  { %v1667_v43 = vadd.f32 %v1666_v11, %v1589_v12  ;;  %v2756_v12 = vld [vmem:[%s4851_s5 + $0x2f8] sm:$0xff]  ;;  %v2737_v11 = vld [vmem:[%s4851_s5 + $0x260] sm:$0xff] }
 0x220   :  { %v1737_v36 = vpop.f32.mrf.mxu1 }
 0x221   :  { %v1748_v17 = vadd.f32 %v1737_v36, %v1659_v14  ;;  %v2739_v14 = vld [vmem:[%s4851_s5 + $0x270] sm:$0xff]  ;;  %v2754_v36 = vld [vmem:[%s4851_s5 + $0x2e8] sm:$0xff] }
 0x222   :  { %v1739_v34 = vpop.f32.mrf.mxu1 }
 0x223   :  { %v1749_v58 = vadd.f32 %v1739_v34, %v1661_v15  ;;  %v1752_v59 = vmax.f32 %v1511_v35, %v1748_v17  ;;  %v2738_v15 = vld [vmem:[%s4851_s5 + $0x268] sm:$0xff]  ;;  %v2753_v17 = vld [vmem:[%s4851_s5 + $0x2e0] sm:$0xff]  ;;  %v2752_v34 = vld [vmem:[%s4851_s5 + $0x2d8] sm:$0xff] }
 0x224   :  { %v1743_v45 = vpop.f32.mrf.mxu1  ;;  %v2736_v35 = vld [vmem:[%s4851_s5 + $0x258] sm:$0xff] }
 0x225   :  { %v1753_v38 = vmax.f32 %v1512_v3, %v1749_v58  ;;  %v1750_v10 = vadd.f32 %v1743_v45, %v1665_v6  ;;  %v2751_v3 = vld [vmem:[%s4851_s5 + $0x2d0] sm:$0xff]  ;;  %v2750_v58 = vld [vmem:[%s4851_s5 + $0x2c8] sm:$0xff] }
 0x226   :  { %v1745_v46 = vpop.f32.mrf.mxu1  ;;  %v2735_v6 = vld [vmem:[%s4851_s5 + $0x250] sm:$0xff]  ;;  %v2734_v45 = vld [vmem:[%s4851_s5 + $0x248] sm:$0xff] }
 0x227   :  { %v1756_v47 = vmax.f32 %v1752_v59, %v1753_v38  ;;  %v1754_v48 = vmax.f32 %v1513_v44, %v1750_v10  ;;  %v1751_v49 = vadd.f32 %v1745_v46, %v1667_v43  ;;  %v2696_v44 = vld [vmem:[%s4851_s5 + $0x118] sm:$0xff]  ;;  %v2749_v43 = vld [vmem:[%s4851_s5 + $0x2c0] sm:$0xff]  ;;  %v2731_v46 = vld [vmem:[%s4851_s5 + $0x230] sm:$0xff] }
 0x228   :  { %v2733_v59 = vld [vmem:[%s4851_s5 + $0x240] sm:$0xff]  ;;  %v2748_v38 = vld [vmem:[%s4851_s5 + $0x2b8] sm:$0xff] }
 0x229   :  { %v1764_v50 = vadd.f32 %v2676_v4, %v1756_v47  ;;  %v1755_v51 = vmax.f32 %v1514_v7, %v1751_v49  ;;  %v2695_v7 = vld [vmem:[%s4851_s5 + $0x110] sm:$0xff]  ;;  %v2732_v10 = vld [vmem:[%s4851_s5 + $0x238] sm:$0xff]  ;;  %v2746_v47 = vld [vmem:[%s4851_s5 + $0x2a8] sm:$0xff] }
 0x22a   :  { %v2745_v49 = vld [vmem:[%s4851_s5 + $0x2a0] sm:$0xff] }
 0x22b   :  { %v4486_v52 = vmax.f32 %v1764_v50, 0.0  ;;  %v1757_v53 = vmax.f32 %v1754_v48, %v1755_v51  ;;  %v2730_v48 = vld [vmem:[%s4851_s5 + $0x228] sm:$0xff]  ;;  %v2729_v50 = vld [vmem:[%s4851_s5 + $0x220] sm:$0xff]  ;;  %v2744_v51 = vld [vmem:[%s4851_s5 + $0x298] sm:$0xff] }
 0x22d   :  { %v4491_v55 = vadd.f32 %v2676_v4, %v1757_v53  ;;  %2965 = vmatmul.mubr.f32.vlgmr.msra.gmra.mxu1 %v4486_v52  ;;  %v1802_v18 = vrot.slane %v4486_v52, 2  ;;  %v2051_v56 = vrot.slane %v4486_v52, 6  ;;  %v1961_v16 = vrot.slane %v4486_v52, 4  ;;  %v2747_v4 = vld [vmem:[%s4851_s5 + $0x2b0] sm:$0xff]  ;;  %v2728_v52 = vld [vmem:[%s4851_s5 + $0x218] sm:$0xff] }
 0x22e   :  { %3003 = vmatpush3.msra.mxu1 %v2724_v54  ;;  %3034 = vmatprep.mubr.msk.f32.mxu1 %vm3196_vm2, %v4949_v31  ;;  %v2743_v53 = vld [vmem:[%s4851_s5 + $0x290] sm:$0xff] }
 0x22f   :  { %3004 = vmatprep.subr.mxu1 %v4949_v31  ;;  %2930 = vmatmul.mubr.f32.vlgmr.msra.gmra.mxu0 %v1802_v18  ;;  %v2727_v54 = vld [vmem:[%s4851_s5 + $0x210] sm:$0xff]  ;;  %v4735_v18 = vmax.f32 %v4491_v55, 0.0  ;;  %v2741_v55 = vld [vmem:[%s4851_s5 + $0x280] sm:$0xff] }
 0x230   :  { %2968 = vmatpush3.msra.mxu0 %v2708_v19  ;;  %3005 = vmatpush3.msra.mxu1 %v2723_v20  ;;  %v2742_v19 = vld [vmem:[%s4851_s5 + $0x288] sm:$0xff] }
 0x231   :  { %2969 = vmatprep.subr.mxu0 %v4949_v31  ;;  %3006 = vmatprep.subr.mxu1 %v4949_v31  ;;  %v2726_v20 = vld [vmem:[%s4851_s5 + $0x208] sm:$0xff] }
 0x232   :  { %2970 = vmatpush3.msra.mxu0 %v2707_v21  ;;  %3007 = vmatpush3.msra.mxu1 %v2722_v22  ;;  %v2230_v21 = vrot.slane %v4735_v18, 2  ;;  %v2725_v22 = vld [vmem:[%s4851_s5 + $0x200] sm:$0xff] }
 0x233   :  { %2971 = vmatprep.subr.mxu0 %v4949_v31  ;;  %3008 = vmatprep.subr.mxu1 %v4949_v31 }
 0x234   :  { %2972 = vmatpush3.msra.mxu0 %v2706_v23  ;;  %3009 = vmatpush3.msra.mxu1 %v2721_v24  ;;  %v2772_v23 = vld [vmem:[%s4851_s5 + $0x378] sm:$0xff]  ;;  %v2771_v24 = vld [vmem:[%s4851_s5 + $0x370] sm:$0xff] }
 0x235   :  { %2973 = vmatprep.subr.mxu0 %v4949_v31  ;;  %3010 = vmatprep.subr.mxu1 %v4949_v31 }
 0x236   :  { %2974 = vmatpush3.msra.mxu0 %v2705_v25  ;;  %3011 = vmatpush3.msra.mxu1 %v2720_v26  ;;  %v2770_v25 = vld [vmem:[%s4851_s5 + $0x368] sm:$0xff]  ;;  %v2769_v26 = vld [vmem:[%s4851_s5 + $0x360] sm:$0xff] }
 0x237   :  { %2975 = vmatprep.subr.mxu0 %v4949_v31  ;;  %3012 = vmatprep.subr.mxu1 %v4949_v31 }
 0x238   :  { %2976 = vmatpush3.msra.mxu0 %v2704_v27  ;;  %3013 = vmatpush3.msra.mxu1 %v2719_v28  ;;  %v2768_v27 = vld [vmem:[%s4851_s5 + $0x358] sm:$0xff]  ;;  %v2767_v28 = vld [vmem:[%s4851_s5 + $0x350] sm:$0xff] }
 0x239   :  { %2977 = vmatprep.subr.mxu0 %v4949_v31  ;;  %3014 = vmatprep.subr.mxu1 %v4949_v31 }
 0x23a   :  { %2978 = vmatpush3.msra.mxu0 %v2703_v29  ;;  %3015 = vmatpush3.msra.mxu1 %v2718_v30  ;;  %v2766_v29 = vld [vmem:[%s4851_s5 + $0x348] sm:$0xff]  ;;  %v2765_v30 = vld [vmem:[%s4851_s5 + $0x340] sm:$0xff] }
 0x23b   :  { %2979 = vmatprep.subr.mxu0 %v4949_v31  ;;  %3016 = vmatprep.subr.mxu1 %v4949_v31 }
 0x23c   :  { %2980 = vmatpush3.msra.mxu0 %v2702_v9  ;;  %3017 = vmatpush3.msra.mxu1 %v2717_v0  ;;  %v2764_v9 = vld [vmem:[%s4851_s5 + $0x338] sm:$0xff]  ;;  %v2763_v0 = vld [vmem:[%s4851_s5 + $0x330] sm:$0xff] }
 0x23d   :  { %2981 = vmatprep.subr.mxu0 %v4949_v31  ;;  %3018 = vmatprep.subr.mxu1 %v4949_v31 }
 0x23e   :  { %2982 = vmatpush3.msra.mxu0 %v2701_v37  ;;  %3019 = vmatpush3.msra.mxu1 %v2716_v62  ;;  %v2762_v37 = vld [vmem:[%s4851_s5 + $0x328] sm:$0xff]  ;;  %v2761_v62 = vld [vmem:[%s4851_s5 + $0x320] sm:$0xff] }
 0x23f   :  { %2983 = vmatprep.subr.mxu0 %v4949_v31  ;;  %3020 = vmatprep.subr.mxu1 %v4949_v31 }
 0x240   :  { %2984 = vmatpush3.msra.mxu0 %v2700_v42  ;;  %3021 = vmatpush3.msra.mxu1 %v2715_v5  ;;  %v2760_v42 = vld [vmem:[%s4851_s5 + $0x318] sm:$0xff]  ;;  %v2759_v5 = vld [vmem:[%s4851_s5 + $0x310] sm:$0xff] }
 0x241   :  { %2985 = vmatprep.subr.mxu0 %v4949_v31  ;;  %3022 = vmatprep.subr.mxu1 %v4949_v31 }
 0x242   :  { %2986 = vmatpush3.msra.mxu0 %v2699_v2  ;;  %3023 = vmatpush3.msra.mxu1 %v2714_v63  ;;  %v2758_v2 = vld [vmem:[%s4851_s5 + $0x308] sm:$0xff]  ;;  %v2757_v63 = vld [vmem:[%s4851_s5 + $0x300] sm:$0xff] }
 0x243   :  { %2987 = vmatprep.subr.mxu0 %v4949_v31  ;;  %3024 = vmatprep.subr.mxu1 %v4949_v31 }
 0x244   :  { %2988 = vmatpush3.msra.mxu0 %v2698_v60  ;;  %3025 = vmatpush3.msra.mxu1 %v2713_v13  ;;  %v2320_v60 = vrot.slane %v4735_v18, 4  ;;  %v2402_v13 = vld [vmem:[%s4853_s7] sm:$0xff] }
 0x245   :  { %2989 = vmatprep.subr.mxu0 %v4949_v31  ;;  %3026 = vmatprep.subr.mxu1 %v4949_v31 }
 0x246   :  { %2990 = vmatpush3.msra.mxu0 %v2697_v40  ;;  %3027 = vmatpush3.msra.mxu1 %v2712_v1 }
 0x247   :  { %2991 = vmatprep.subr.mxu0 %v4949_v31  ;;  %3028 = vmatprep.subr.mxu1 %v4949_v31 }
 0x248   :  { %2992 = vmatpush3.msra.mxu0 %v2696_v44  ;;  %3029 = vmatpush3.msra.mxu1 %v2711_v41 }
 0x249   :  { %2993 = vmatprep.subr.mxu0 %v4949_v31  ;;  %3030 = vmatprep.subr.mxu1 %v4949_v31 }
 0x24a   :  { %2994 = vmatpush3.msra.mxu0 %v2695_v7  ;;  %3031 = vmatpush3.msra.mxu1 %v2710_v8 }
 0x24b   :  { %2995 = vmatprep.subr.mxu0 %v4949_v31  ;;  %3032 = vmatprep.subr.mxu1 %v4949_v31 }
 0x24c   :  { %2996 = vmatpush3.msra.mxu0 %v2694_v57  ;;  %3033 = vmatpush3.msra.mxu1 %v2709_v39 }
 0x24d   :  { %2997 = vmatprep.subr.mxu0 %v4949_v31  ;;  %3035 = vmatmul.mubr.f32.vlgmr.msra.gmra.mxu1 %v2051_v56 }
 0x24e   :  { %3072 = vmatprep.subr.mxu1 %v4949_v31  ;;  %2998 = vmatpush3.msra.mxu0 %v2693_v61 }
 0x24f   :  { %2999 = vmatprep.mubr.msk.f32.mxu0 %vm3196_vm2, %v4949_v31  ;;  %3073 = vmatpush3.msra.mxu1 %v2756_v12 }
 0x250   :  { %3000 = vmatmul.mubr.f32.vlgmr.msra.gmra.mxu0 %v1961_v16  ;;  %3037 = vmatprep.subr.mxu0 %v4949_v31 }
 0x251   :  { %3074 = vmatprep.subr.mxu1 %v4949_v31  ;;  %3038 = vmatpush3.msra.mxu0 %v2740_v32 }
 0x252   :  { %3075 = vmatpush3.msra.mxu1 %v2755_v33  ;;  %3039 = vmatprep.subr.mxu0 %v4949_v31 }
 0x253   :  { %3076 = vmatprep.subr.mxu1 %v4949_v31  ;;  %3040 = vmatpush3.msra.mxu0 %v2739_v14 }
 0x254   :  { %3077 = vmatpush3.msra.mxu1 %v2754_v36  ;;  %3041 = vmatprep.subr.mxu0 %v4949_v31 }
 0x255   :  { %3078 = vmatprep.subr.mxu1 %v4949_v31  ;;  %3042 = vmatpush3.msra.mxu0 %v2738_v15  ;;  %v2773_v15 = vld [vmem:[%s4852_s6] ss:$0 sm:$0xff] }
 0x256   :  { %3079 = vmatpush3.msra.mxu1 %v2753_v17  ;;  %3043 = vmatprep.subr.mxu0 %v4949_v31 }
 0x257   :  { %3080 = vmatprep.subr.mxu1 %v4949_v31  ;;  %3044 = vmatpush3.msra.mxu0 %v2737_v11 }
 0x258   :  { %3081 = vmatpush3.msra.mxu1 %v2752_v34  ;;  %3045 = vmatprep.subr.mxu0 %v4949_v31 }
 0x259   :  { %3082 = vmatprep.subr.mxu1 %v4949_v31  ;;  %3046 = vmatpush3.msra.mxu0 %v2736_v35 }
 0x25a   :  { %3083 = vmatpush3.msra.mxu1 %v2751_v3  ;;  %3047 = vmatprep.subr.mxu0 %v4949_v31 }
 0x25b   :  { %3084 = vmatprep.subr.mxu1 %v4949_v31  ;;  %3048 = vmatpush3.msra.mxu0 %v2735_v6 }
 0x25c   :  { %3085 = vmatpush3.msra.mxu1 %v2750_v58  ;;  %3049 = vmatprep.subr.mxu0 %v4949_v31 }
 0x25d   :  { %3086 = vmatprep.subr.mxu1 %v4949_v31  ;;  %3050 = vmatpush3.msra.mxu0 %v2734_v45 }
 0x25e   :  { %3087 = vmatpush3.msra.mxu1 %v2749_v43  ;;  %3051 = vmatprep.subr.mxu0 %v4949_v31 }
 0x25f   :  { %3088 = vmatprep.subr.mxu1 %v4949_v31  ;;  %3052 = vmatpush3.msra.mxu0 %v2733_v59 }
 0x260   :  { %3089 = vmatpush3.msra.mxu1 %v2748_v38  ;;  %3053 = vmatprep.subr.mxu0 %v4949_v31 }
 0x261   :  { %3090 = vmatprep.subr.mxu1 %v4949_v31  ;;  %3054 = vmatpush3.msra.mxu0 %v2732_v10 }
 0x262   :  { %3091 = vmatpush3.msra.mxu1 %v2747_v4  ;;  %3055 = vmatprep.subr.mxu0 %v4949_v31 }
 0x263   :  { %3092 = vmatprep.subr.mxu1 %v4949_v31  ;;  %3056 = vmatpush3.msra.mxu0 %v2731_v46 }
 0x264   :  { %3093 = vmatpush3.msra.mxu1 %v2746_v47  ;;  %3057 = vmatprep.subr.mxu0 %v4949_v31 }
 0x265   :  { %3094 = vmatprep.subr.mxu1 %v4949_v31  ;;  %3058 = vmatpush3.msra.mxu0 %v2730_v48 }
 0x266   :  { %3095 = vmatpush3.msra.mxu1 %v2745_v49  ;;  %3059 = vmatprep.subr.mxu0 %v4949_v31 }
 0x267   :  { %3096 = vmatprep.subr.mxu1 %v4949_v31  ;;  %3060 = vmatpush3.msra.mxu0 %v2729_v50 }
 0x268   :  { %3097 = vmatpush3.msra.mxu1 %v2744_v51  ;;  %3061 = vmatprep.subr.mxu0 %v4949_v31 }
 0x269   :  { %3098 = vmatprep.subr.mxu1 %v4949_v31  ;;  %3062 = vmatpush3.msra.mxu0 %v2728_v52 }
 0x26a   :  { %3099 = vmatpush3.msra.mxu1 %v2743_v53  ;;  %3063 = vmatprep.subr.mxu0 %v4949_v31 }
 0x26b   :  { %3100 = vmatprep.subr.mxu1 %v4949_v31  ;;  %3064 = vmatpush3.msra.mxu0 %v2727_v54 }
 0x26c   :  { %3101 = vmatpush3.msra.mxu1 %v2742_v19  ;;  %3065 = vmatprep.subr.mxu0 %v4949_v31 }
 0x26d   :  { %3102 = vmatprep.subr.mxu1 %v4949_v31  ;;  %3066 = vmatpush3.msra.mxu0 %v2726_v20 }
 0x26e   :  { %3103 = vmatpush3.msra.mxu1 %v2741_v55  ;;  %3104 = vmatprep.mubr.msk.f32.mxu1 %vm3196_vm2, %v4949_v31 }
 0x26f   :  { %3067 = vmatprep.subr.mxu0 %v4949_v31  ;;  %3105 = vmatmul.mubr.f32.vlgmr.msra.gmra.mxu1 %v2230_v21 }
 0x270   :  { %3068 = vmatpush3.msra.mxu0 %v2725_v22  ;;  %3069 = vmatprep.mubr.msk.f32.mxu0 %vm3196_vm2, %v4949_v31 }
 0x271   :  { %3070 = vmatmul.mubr.f32.vlgmr.msra.gmra.mxu0 %v4735_v18  ;;  %3107 = vmatprep.subr.mxu0 %v4949_v31 }
 0x272   :  { %3108 = vmatpush3.msra.mxu0 %v2772_v23  ;;  %3139 = vmatprep.mubr.msk.f32.mxu0 %vm3196_vm2, %v4949_v31 }
 0x273   :  { %3109 = vmatprep.subr.mxu0 %v4949_v31  ;;  %3142 = vmatprep.subr.mxu1 %v4949_v31 }
 0x274   :  { %3110 = vmatpush3.msra.mxu0 %v2771_v24  ;;  %3144 = vmatprep.mubr.msk.f32.mxu1 %vm3196_vm2, %v4949_v31 }
 0x275   :  { %3111 = vmatprep.subr.mxu0 %v4949_v31  ;;  %3143 = vmatpush3.msra.mxu1 %v2402_v13 }
 0x276   :  { %3112 = vmatpush3.msra.mxu0 %v2770_v25 }
 0x277   :  { %3113 = vmatprep.subr.mxu0 %v4949_v31 }
 0x278   :  { %3114 = vmatpush3.msra.mxu0 %v2769_v26 }
 0x279   :  { %3115 = vmatprep.subr.mxu0 %v4949_v31 }
 0x27a   :  { %3116 = vmatpush3.msra.mxu0 %v2768_v27 }
 0x27b   :  { %3117 = vmatprep.subr.mxu0 %v4949_v31 }
 0x27c   :  { %3118 = vmatpush3.msra.mxu0 %v2767_v28 }
 0x27d   :  { %3119 = vmatprep.subr.mxu0 %v4949_v31 }
 0x27e   :  { %3120 = vmatpush3.msra.mxu0 %v2766_v29 }
 0x27f   :  { %3121 = vmatprep.subr.mxu0 %v4949_v31 }
 0x280   :  { %3122 = vmatpush3.msra.mxu0 %v2765_v30 }
 0x281   :  { %3123 = vmatprep.subr.mxu0 %v4949_v31 }
 0x282   :  { %3124 = vmatpush3.msra.mxu0 %v2764_v9 }
 0x283   :  { %3125 = vmatprep.subr.mxu0 %v4949_v31 }
 0x284   :  { %3126 = vmatpush3.msra.mxu0 %v2763_v0 }
 0x285   :  { %3127 = vmatprep.subr.mxu0 %v4949_v31 }
 0x286   :  { %3128 = vmatpush3.msra.mxu0 %v2762_v37 }
 0x287   :  { %3129 = vmatprep.subr.mxu0 %v4949_v31 }
 0x288   :  { %3130 = vmatpush3.msra.mxu0 %v2761_v62 }
 0x289   :  { %3131 = vmatprep.subr.mxu0 %v4949_v31 }
 0x28a   :  { %3132 = vmatpush3.msra.mxu0 %v2760_v42 }
 0x28b   :  { %3133 = vmatprep.subr.mxu0 %v4949_v31 }
 0x28c   :  { %3134 = vmatpush3.msra.mxu0 %v2759_v5 }
 0x28d   :  { %3135 = vmatprep.subr.mxu0 %v4949_v31 }
 0x28e   :  { %3136 = vmatpush3.msra.mxu0 %v2758_v2 }
 0x28f   :  { %3137 = vmatprep.subr.mxu0 %v4949_v31 }
 0x290   :  { %3138 = vmatpush3.msra.mxu0 %v2757_v63 }
 0x291   :  { %3140 = vmatmul.mubr.f32.vlgmr.msra.gmra.mxu0 %v2320_v60 }
 0x2ed   :  { %v1940_v40 = vpop.f32.mrf.mxu1 }
 0x2ef   :  { %v1870_v1 = vpop.f32.mrf.mxu0  ;;  %v2966_v44 = vpop.f32.mrf.mxu1 }
 0x2f0   :  { %v1941_v41 = vadd.f32 %v1940_v40, %v1870_v1 }
 0x2f1   :  { %v2931_v7 = vpop.f32.mrf.mxu0 }
 0x30d   :  { %v2119_v8 = vpop.f32.mrf.mxu1 }
 0x30f   :  { %v3036_v57 = vpop.f32.mrf.mxu1 }
 0x310   :  { %v2029_v39 = vpop.f32.mrf.mxu0 }
 0x311   :  { %v2033_v32 = vadd.f32 %v2029_v39, %v1941_v41 }
 0x312   :  { %v3001_v56 = vpop.f32.mrf.mxu0 }
 0x313   :  { %v2123_v33 = vadd.f32 %v2119_v8, %v2033_v32 }
 0x32f   :  { %v2298_v61 = vpop.f32.mrf.mxu1 }
 0x331   :  { %v2207_v31 = vpop.f32.mrf.mxu0  ;;  %v3106_v12 = vpop.f32.mrf.mxu1 }
 0x332   :  { %v2211_v14 = vadd.f32 %v2207_v31, %v2123_v33 }
 0x333   :  { %v3071_v16 = vpop.f32.mrf.mxu0 }
 0x334   :  { %v2302_v36 = vadd.f32 %v2298_v61, %v2211_v14 }
 0x351   :  { %v2388_v17 = vpop.f32.mrf.mxu0 }
 0x352   :  { %v2392_v11 = vadd.f32 %v2388_v17, %v2302_v36 }
 0x353   :  { %v3141_v34 = vpop.f32.mrf.mxu0 }
 0x354   :  { %v2399_v35 = vadd.f32 %v2773_v15, %v2392_v11 }
 0x356   :  { %3145 = vmatmul.mubr.msk.f32.vlgmr.msra.gmra.mxu1 %vm2409_vm3, %v2399_v35  ;;  %2401 = vst.msk [vmem:[#allocation3] sm:$0x3] %vm2400_vm4, %v2399_v35 }
 0x357   :  { %3162 = shalt.err (!%p3159_p4)
}
 0x358   :  { %2496 = dma.vmem_to_hbm [thread:$0]  %s2494_s20, 32, %s4856_s10, [#allocation4]   ;;  %v2774_v3 = vld [vmem:[%s4854_s8] ss:$0 sm:$0xff]  ;;  %vm2483_vm5 = vcmask 74752  }
 0x359   :  { %s3198_s25 = smov [#allocation5]  }
 0x35a   :  { %s2503_s26 = sshll.u32 %s3198_s25, 4  ;;  %s2504_s26 = int_to_ptr.vmem [resolvable:$true] %s2503_s26 }
 0x35b   :  { %s3171_s27 = scalar_lea.vmem %s2504_s26, 32  ;;  %p3176_p6 = scmp.lt.s32.totalorder %s2504_s26, %s2504_s26 }
 0x35c   :  { %p3172_p5 = scmp.ne.s32.totalorder %s2504_s26, %s3171_s27  ;;  %p3177_p7 = scmp.lt.s32.totalorder %s3171_s27, %s3171_s27 }
 0x35e   :  { %p3178_p8 = por %p3177_p7, %p3176_p6 }
 0x360   :  { %p3179_p9 = pnand %p3178_p8, %p3172_p5 }
 0x416   :  { %v2479_v6 = vpop.f32.mrf.mxu1 }
 0x417   :  { %v2480_v58 = vadd.f32 %v2774_v3, %v2479_v6 }
 0x418   :  { %v3146_v45 = vpop.f32.mrf.mxu1 }
 0x419   :  { %2484 = vst.msk [vmem:[#allocation5] sm:$0x3] %vm2483_vm5, %v2480_v58 }
 0x41a   :  { %3182 = shalt.err (!%p3179_p9)
}
 0x41b   :  { %2506 = dma.vmem_to_hbm [thread:$0]  %s2504_s26, 32, %s4857_s11, [#allocation6]  }
 0x41c   :  { %3191 = dma.done.wait [#allocation4], 32  }
 0x41d   :  { %3192 = vsyncadd [#allocation4], 4294967264 }
 0x41e   :  { %3193 = dma.done.wait [#allocation6], 32  }
 0x41f   :  { %3194 = vsyncadd [#allocation6], 4294967264 }
 0x420   :  { %2515 = vsyncpa [#allocation4], 1 }
 0x421   :  { %2516 = vsyncpa [#allocation6], 1 }

</bundles_post_ra>
